<compile_context>
chip_gen: v6e
topology: v6e:2x2x1
jax: 0.10.0
libtpu: 0.0.40
codegen_flags: <defaults>
</compile_context>

<pallas_src>
import functools
import math

import jax
import jax.numpy as jnp
from jax.experimental import pallas as pl
from jax.experimental.pallas import tpu as pltpu

N_QUANTILES = 8
N_ACTIONS = 6


def _round_up(x, m):
    return (x + m - 1) // m * m


def _choose_row_tile(m, tm_max):
    """16-align rows (bf16 packs two rows/sublane) and pick a balanced tile."""
    m_pad = _round_up(m, 16)
    if m_pad <= tm_max:
        return m_pad, m_pad
    n_steps = -(-m_pad // tm_max)
    tm = _round_up(-(-m_pad // n_steps), 16)
    return tm * n_steps, tm


# ----------------------------- Pallas kernels -------------------------------

def _linear_kernel(x_ref, w_ref, b_ref, o_ref, *, relu):
    # bf16 x bf16 -> f32 accumulate on the MXU; bias + ReLU in f32 on the VPU.
    y = jnp.dot(x_ref[...], w_ref[...], preferred_element_type=jnp.float32)
    y = y + b_ref[...]                       # (TM, N_pad) + (1, N_pad)
    if relu:
        y = jnp.maximum(y, 0.0)
    o_ref[...] = y.astype(o_ref.dtype)


def pallas_linear(x, w, b, *, relu=False, out_dtype=jnp.float32,
                  keep_lane_pad=False):
    """y = x @ w + b (optionally ReLU).  x: (M, K), w: (K, N), b: (N,)."""
    M, K = x.shape
    Kw, N = w.shape
    assert K == Kw

    x = x.astype(jnp.bfloat16)
    w = w.astype(jnp.bfloat16)
    b = b.astype(jnp.float32).reshape(1, N)

    # Lane-dense K (zero padding on both operands => exact result).
    K_pad = _round_up(K, 128)
    if K_pad != K:
        x = jnp.pad(x, ((0, 0), (0, K_pad - K)))
        w = jnp.pad(w, ((0, K_pad - K), (0, 0)))

    # Lane-dense output (unmasked vector stores).
    N_pad = _round_up(N, 128)
    if N_pad != N:
        w = jnp.pad(w, ((0, 0), (0, N_pad - N)))
        b = jnp.pad(b, ((0, 0), (0, N_pad - N)))

    # Balanced row tiles: conv-style (small K) layers are step-overhead / HBM
    # bound -> big tiles; large-K matmuls keep TM modest for VMEM headroom.
    tm_max = 2048 if K_pad <= 1024 else 512
    M_pad, TM = _choose_row_tile(M, tm_max)
    if M_pad != M:
        x = jnp.pad(x, ((0, M_pad - M), (0, 0)))

    out = pl.pallas_call(
        functools.partial(_linear_kernel, relu=relu),
        out_shape=jax.ShapeDtypeStruct((M_pad, N_pad), out_dtype),
        grid=(M_pad // TM,),
        in_specs=[
            pl.BlockSpec((TM, K_pad), lambda i: (i, 0)),      # activations
            pl.BlockSpec((K_pad, N_pad), lambda i: (0, 0)),   # weights: resident
            pl.BlockSpec((1, N_pad), lambda i: (0, 0)),       # bias: resident
        ],
        out_specs=pl.BlockSpec((TM, N_pad), lambda i: (i, 0)),
        compiler_params=pltpu.CompilerParams(
            dimension_semantics=("parallel",)),
    )(x, w, b)

    out = out[:M] if M_pad != M else out
    if keep_lane_pad:
        return out            # caller slices real channels lazily (fused)
    return out[:, :N]


def _dueling_head_kernel(x_ref, wv1_ref, wa1_ref, bv1_ref, ba1_ref,
                         wv2_ref, wa2_ref, b2_ref, o_ref):
    # Fused: hv = relu(x@wv1+bv1); ha = relu(x@wa1+ba1);
    #        out = hv@wv2_bcast + ha@wa2_centered + b2   (dueling pre-folded).
    x = x_ref[...]
    hv = jnp.dot(x, wv1_ref[...], preferred_element_type=jnp.float32) + bv1_ref[...]
    ha = jnp.dot(x, wa1_ref[...], preferred_element_type=jnp.float32) + ba1_ref[...]
    hv = jnp.maximum(hv, 0.0).astype(jnp.bfloat16)
    ha = jnp.maximum(ha, 0.0).astype(jnp.bfloat16)
    y = jnp.dot(hv, wv2_ref[...], preferred_element_type=jnp.float32)
    y = y + jnp.dot(ha, wa2_ref[...], preferred_element_type=jnp.float32)
    y = y + b2_ref[...]
    o_ref[...] = y.astype(o_ref.dtype)


def pallas_dueling_head(x, wv1, bv1, wa1, ba1, wv2b, wa2c, b2):
    """Fused noisy dueling head.  x: (M, K); returns (M, A*NQ) f32."""
    M, K = x.shape
    H = wv1.shape[1]
    N = wv2b.shape[1]

    x = x.astype(jnp.bfloat16)
    wv1 = wv1.astype(jnp.bfloat16)
    wa1 = wa1.astype(jnp.bfloat16)
    wv2b = wv2b.astype(jnp.bfloat16)
    wa2c = wa2c.astype(jnp.bfloat16)
    bv1 = bv1.astype(jnp.float32).reshape(1, H)
    ba1 = ba1.astype(jnp.float32).reshape(1, H)
    b2 = b2.astype(jnp.float32).reshape(1, N)

    K_pad = _round_up(K, 128)
    if K_pad != K:
        x = jnp.pad(x, ((0, 0), (0, K_pad - K)))
        wv1 = jnp.pad(wv1, ((0, K_pad - K), (0, 0)))
        wa1 = jnp.pad(wa1, ((0, K_pad - K), (0, 0)))
    N_pad = _round_up(N, 128)
    if N_pad != N:
        wv2b = jnp.pad(wv2b, ((0, 0), (0, N_pad - N)))
        wa2c = jnp.pad(wa2c, ((0, 0), (0, N_pad - N)))
        b2 = jnp.pad(b2, ((0, 0), (0, N_pad - N)))

    # Resident (K_pad, 512) weights dominate VMEM -> keep TM at <=512.
    M_pad, TM = _choose_row_tile(M, 512)
    if M_pad != M:
        x = jnp.pad(x, ((0, M_pad - M), (0, 0)))

    out = pl.pallas_call(
        _dueling_head_kernel,
        out_shape=jax.ShapeDtypeStruct((M_pad, N_pad), jnp.float32),
        grid=(M_pad // TM,),
        in_specs=[
            pl.BlockSpec((TM, K_pad), lambda i: (i, 0)),    # conv features
            pl.BlockSpec((K_pad, H), lambda i: (0, 0)),     # value layer-1 W
            pl.BlockSpec((K_pad, H), lambda i: (0, 0)),     # advantage layer-1 W
            pl.BlockSpec((1, H), lambda i: (0, 0)),
            pl.BlockSpec((1, H), lambda i: (0, 0)),
            pl.BlockSpec((H, N_pad), lambda i: (0, 0)),     # value W broadcast
            pl.BlockSpec((H, N_pad), lambda i: (0, 0)),     # centered adv W
            pl.BlockSpec((1, N_pad), lambda i: (0, 0)),     # combined bias
        ],
        out_specs=pl.BlockSpec((TM, N_pad), lambda i: (i, 0)),
        compiler_params=pltpu.CompilerParams(
            dimension_semantics=("parallel",)),
    )(x, wv1, wa1, bv1, ba1, wv2b, wa2c, b2)
    return out[:M, :N]


# ------------------------------- conv glue ---------------------------------

def im2col_nhwc(x, kh, kw, stride):
    """x: (B, H, W, C) -> (B*Ho*Wo, kh*kw*C); feature order (kh, kw, C)."""
    B, H, W, C = x.shape
    Ho = (H - kh) // stride + 1
    Wo = (W - kw) // stride + 1
    cols = []
    for i in range(kh):
        for j in range(kw):
            cols.append(x[:, i:i + stride * Ho:stride, j:j + stride * Wo:stride, :])
    cols = jnp.stack(cols, axis=3)            # (B, Ho, Wo, kh*kw, C)
    return cols.reshape(B * Ho * Wo, kh * kw * C), Ho, Wo


# TODO(synk): for full-size Atari inputs, do patch extraction inside the kernel
# (manual DMA over overlapping windows) instead of materializing cols in HBM.
def conv2d_nhwc(x, c_in, p, *, k, stride):
    """x: (B,H,W,C_store) NHWC, real channels in x[..., :c_in].  `k`, `stride`
    are static Python ints.  Returns lane-padded NHWC output (128 channels)."""
    B = x.shape[0]
    cols, Ho, Wo = im2col_nhwc(x[..., :c_in], k, k, stride)
    y = pallas_linear(cols, p["w"], p["b"], relu=True,
                      out_dtype=jnp.bfloat16, keep_lane_pad=True)
    return y.reshape(B, Ho, Wo, y.shape[-1])


# ------------------------- parameter initialization -------------------------

def conv_init(key, cin, cout, k):
    """Same init distribution as nn.Conv2d, stored in im2col (kh,kw,Cin)->Cout
    layout (distribution-equivalent reindexing of the PyTorch layout)."""
    k1, k2 = jax.random.split(key)
    fan_in = cin * k * k
    bound = 1.0 / math.sqrt(fan_in)
    w = jax.random.uniform(k1, (k * k * cin, cout), jnp.float32, -bound, bound)
    b = jax.random.uniform(k2, (cout,), jnp.float32, -bound, bound)
    return {"w": w, "b": b}          # NOTE: no Python scalars in the pytree


def noisy_init(key, in_f, out_f, sigma_zero=0.4):
    """NoisyFactorizedLinear params stored in (in_f, out_f) layout."""
    k1, k2 = jax.random.split(key)
    bound = 1.0 / math.sqrt(in_f)
    w = jax.random.uniform(k1, (in_f, out_f), jnp.float32, -bound, bound)
    b = jax.random.uniform(k2, (out_f,), jnp.float32, -bound, bound)
    s = sigma_zero / math.sqrt(in_f)
    return {"w": w, "b": b,
            "sw": jnp.full((in_f, out_f), s, jnp.float32),
            "sb": jnp.full((out_f,), s, jnp.float32)}


def noisy_effective_params(p, key):
    """Fold factorized gaussian noise into effective (W, b), W in (in_f, out_f)."""
    in_f, out_f = p["w"].shape
    k1, k2 = jax.random.split(key)
    eps_in = jax.random.normal(k1, (in_f, 1), jnp.float32)
    eps_out = jax.random.normal(k2, (1, out_f), jnp.float32)
    eps_in = jnp.sign(eps_in) * jnp.sqrt(jnp.abs(eps_in))
    eps_out = jnp.sign(eps_out) * jnp.sqrt(jnp.abs(eps_out))
    w_eff = p["w"] + p["sw"] * (eps_in * eps_out)     # (in_f, out_f)
    b_eff = p["b"] + p["sb"] * eps_out[0]
    return w_eff, b_eff


def init_rainbow_params(key, in_channels, conv_out_size, n_actions):
    ks = jax.random.split(key, 7)
    return {
        "conv1": conv_init(ks[0], in_channels, 32, 8),
        "conv2": conv_init(ks[1], 32, 64, 4),
        "conv3": conv_init(ks[2], 64, 64, 3),
        "val1": noisy_init(ks[3], conv_out_size, 512),
        "val2": noisy_init(ks[4], 512, N_QUANTILES),
        "adv1": noisy_init(ks[5], conv_out_size, 512),
        "adv2": noisy_init(ks[6], 512, n_actions * N_QUANTILES),
    }


# --------------------------------- forward ----------------------------------

def rainbow_forward(params, x, noise_key):
    B = x.shape[0]
    # x is NCHW (PyTorch interface); go channels-last once and stay there.
    fx = (x.astype(jnp.float32) / 256.0).astype(jnp.bfloat16)
    fx = fx.transpose(0, 2, 3, 1)                         # (B, H, W, C)

    c0 = fx.shape[-1]
    c1 = params["conv1"]["w"].shape[1]                    # 32 (static)
    c2 = params["conv2"]["w"].shape[1]                    # 64
    c3 = params["conv3"]["w"].shape[1]                    # 64

    h = conv2d_nhwc(fx, c0, params["conv1"], k=8, stride=4)
    h = conv2d_nhwc(h, c1, params["conv2"], k=4, stride=2)
    h = conv2d_nhwc(h, c2, params["conv3"], k=3, stride=1)

    # Head consumes the NHWC-flattened conv features; head-layer-1 weights are
    # stored in that input order (random init => distribution-equivalent to
    # PyTorch's NCHW flatten), so no layout transpose is needed.
    conv_out = h[..., :c3].reshape(B, -1)

    keys = jax.random.split(noise_key, 4)
    wv1, bv1 = noisy_effective_params(params["val1"], keys[0])   # (K, 512)
    wv2, bv2 = noisy_effective_params(params["val2"], keys[1])   # (512, NQ)
    wa1, ba1 = noisy_effective_params(params["adv1"], keys[2])   # (K, 512)
    wa2, ba2 = noisy_effective_params(params["adv2"], keys[3])   # (512, A*NQ)

    hid = wv1.shape[1]
    A = wa2.shape[1] // N_QUANTILES

    # Dueling combine folded into the layer-2 weights/bias (exact by linearity):
    #   out[b,a,q] = val[b,q] + adv[b,a,q] - mean_a' adv[b,a',q]
    wa2_3 = wa2.reshape(hid, A, N_QUANTILES)
    wa2_c = (wa2_3 - wa2_3.mean(axis=1, keepdims=True)).reshape(hid, A * N_QUANTILES)
    ba2_3 = ba2.reshape(A, N_QUANTILES)
    ba2_c = ba2_3 - ba2_3.mean(axis=0, keepdims=True)
    wv2_b = jnp.broadcast_to(wv2[:, None, :], (hid, A, N_QUANTILES)) \
               .reshape(hid, A * N_QUANTILES)
    b2 = (bv2[None, :] + ba2_c).reshape(A * N_QUANTILES)

    out = pallas_dueling_head(conv_out, wv1, bv1, wa1, ba1, wv2_b, wa2_c, b2)
    return out.reshape(B, A, N_QUANTILES)


# ----------------------------------- main ------------------------------------

if __name__ == "__main__":
    key = jax.random.PRNGKey(0)
    k_x, k_params, k_noise = jax.random.split(key, 3)

    # Smallest spatial size the 8/4 -> 4/2 -> 3/1 conv stack admits is 36.
    B, C, H, W = 2, 4, 36, 36
    x = jax.random.randint(k_x, (B, C, H, W), 0, 256, dtype=jnp.int32)

    def _o(h, k, s):
        return (h - k) // s + 1

    h3 = _o(_o(_o(H, 8, 4), 4, 2), 3, 1)
    w3 = _o(_o(_o(W, 8, 4), 4, 2), 3, 1)
    conv_out_size = 64 * h3 * w3            # 36 -> 8 -> 3 -> 1  =>  64

    params = init_rainbow_params(k_params, C, conv_out_size, N_ACTIONS)

    fwd = jax.jit(rainbow_forward)
    out = jax.block_until_ready(fwd(params, x, k_noise))

    assert out.shape == (B, N_ACTIONS, N_QUANTILES), out.shape
    assert out.dtype == jnp.float32
    print("KERNEL_OK")
</pallas_src>

<mosaic_0001>
module attributes {stable_mosaic.version = 11 : i64} {
  func.func @_linear_kernel(%arg0: i32, %arg1: memref<128x256xbf16, #tpu.memory_space<vmem>>, %arg2: memref<256x128xbf16, #tpu.memory_space<vmem>>, %arg3: memref<1x128xf32, #tpu.memory_space<vmem>>, %arg4: memref<128x128xbf16, #tpu.memory_space<vmem>>) attributes {dimension_semantics = [#tpu.dimension_semantics<parallel>], iteration_bounds = array<i64: 1>, scalar_prefetch = 0 : i64, scratch_operands = 0 : i64, tpu.core_type = #tpu.core_type<tc>, window_params = [{transform_indices = @transform_0, window_bounds = array<i64: 128, 256>}, {pipeline_mode = #tpu.pipeline_mode<synchronous>, transform_indices = @transform_1, window_bounds = array<i64: 256, 128>}, {pipeline_mode = #tpu.pipeline_mode<synchronous>, transform_indices = @transform_2, window_bounds = array<i64: 1, 128>}, {transform_indices = @transform_3, window_bounds = array<i64: 128, 128>}]} {
    %c0 = arith.constant 0 : index
    %c0_0 = arith.constant 0 : index
    %0 = vector.load %arg1[%c0, %c0_0] : memref<128x256xbf16, #tpu.memory_space<vmem>>, vector<128x256xbf16>
    %c0_1 = arith.constant 0 : index
    %c0_2 = arith.constant 0 : index
    %1 = vector.load %arg2[%c0_1, %c0_2] : memref<256x128xbf16, #tpu.memory_space<vmem>>, vector<256x128xbf16>
    %cst = arith.constant dense<0.000000e+00> : vector<128x128xf32>
    %2 = tpu.matmul %0, %1, %cst {dimension_numbers = #tpu.dot_dimension_numbers<[1], [0], [0], [1], [0, 0, 1, 1], [], []>} : vector<128x256xbf16>, vector<256x128xbf16>, vector<128x128xf32> -> vector<128x128xf32>
    %c0_3 = arith.constant 0 : index
    %c0_4 = arith.constant 0 : index
    %3 = vector.load %arg3[%c0_3, %c0_4] : memref<1x128xf32, #tpu.memory_space<vmem>>, vector<1x128xf32>
    %4 = vector.broadcast %3 : vector<1x128xf32> to vector<128x128xf32>
    %5 = arith.addf %2, %4 : vector<128x128xf32>
    %cst_5 = arith.constant 0.000000e+00 : f32
    %6 = vector.broadcast %cst_5 : f32 to vector<128x128xf32>
    %7 = arith.maximumf %5, %6 : vector<128x128xf32>
    %8 = arith.truncf %7 : vector<128x128xf32> to vector<128x128xbf16>
    %c0_6 = arith.constant 0 : index
    %c0_7 = arith.constant 0 : index
    %9 = vector.load %arg4[%c0_6, %c0_7] : memref<128x128xbf16, #tpu.memory_space<vmem>>, vector<128x128xbf16>
    tpu.vector_store %arg4[%c0_6, %c0_7], %8 {strides = array<i32>} : memref<128x128xbf16, #tpu.memory_space<vmem>>, vector<128x128xbf16>,
    return
  }
  func.func @transform_0(%arg0: i32) -> (i32, i32) {
    %c0_i32 = arith.constant 0 : i32
    %c0_i32_0 = arith.constant 0 : i32
    return %arg0, %c0_i32 : i32, i32
  }
  func.func @transform_1(%arg0: i32) -> (i32, i32) {
    %c0_i32 = arith.constant 0 : i32
    %c0_i32_0 = arith.constant 0 : i32
    %c0_i32_1 = arith.constant 0 : i32
    return %c0_i32, %c0_i32_0 : i32, i32
  }
  func.func @transform_2(%arg0: i32) -> (i32, i32) {
    %c0_i32 = arith.constant 0 : i32
    %c0_i32_0 = arith.constant 0 : i32
    %c0_i32_1 = arith.constant 0 : i32
    return %c0_i32, %c0_i32_0 : i32, i32
  }
  func.func @transform_3(%arg0: i32) -> (i32, i32) {
    %c0_i32 = arith.constant 0 : i32
    %c0_i32_0 = arith.constant 0 : i32
    return %arg0, %c0_i32 : i32, i32
  }
}

module attributes {stable_mosaic.version = 11 : i64} {
  func.func @_linear_kernel(%arg0: i32, %arg1: memref<32x512xbf16, #tpu.memory_space<vmem>>, %arg2: memref<512x128xbf16, #tpu.memory_space<vmem>>, %arg3: memref<1x128xf32, #tpu.memory_space<vmem>>, %arg4: memref<32x128xbf16, #tpu.memory_space<vmem>>) attributes {dimension_semantics = [#tpu.dimension_semantics<parallel>], iteration_bounds = array<i64: 1>, scalar_prefetch = 0 : i64, scratch_operands = 0 : i64, tpu.core_type = #tpu.core_type<tc>, window_params = [{transform_indices = @transform_0, window_bounds = array<i64: 32, 512>}, {pipeline_mode = #tpu.pipeline_mode<synchronous>, transform_indices = @transform_1, window_bounds = array<i64: 512, 128>}, {pipeline_mode = #tpu.pipeline_mode<synchronous>, transform_indices = @transform_2, window_bounds = array<i64: 1, 128>}, {transform_indices = @transform_3, window_bounds = array<i64: 32, 128>}]} {
    %c0 = arith.constant 0 : index
    %c0_0 = arith.constant 0 : index
    %0 = vector.load %arg1[%c0, %c0_0] : memref<32x512xbf16, #tpu.memory_space<vmem>>, vector<32x512xbf16>
    %c0_1 = arith.constant 0 : index
    %c0_2 = arith.constant 0 : index
    %1 = vector.load %arg2[%c0_1, %c0_2] : memref<512x128xbf16, #tpu.memory_space<vmem>>, vector<512x128xbf16>
    %cst = arith.constant dense<0.000000e+00> : vector<32x128xf32>
    %2 = tpu.matmul %0, %1, %cst {dimension_numbers = #tpu.dot_dimension_numbers<[1], [0], [0], [1], [0, 0, 1, 1], [], []>} : vector<32x512xbf16>, vector<512x128xbf16>, vector<32x128xf32> -> vector<32x128xf32>
    %c0_3 = arith.constant 0 : index
    %c0_4 = arith.constant 0 : index
    %3 = vector.load %arg3[%c0_3, %c0_4] : memref<1x128xf32, #tpu.memory_space<vmem>>, vector<1x128xf32>
    %4 = vector.broadcast %3 : vector<1x128xf32> to vector<32x128xf32>
    %5 = arith.addf %2, %4 : vector<32x128xf32>
    %cst_5 = arith.constant 0.000000e+00 : f32
    %6 = vector.broadcast %cst_5 : f32 to vector<32x128xf32>
    %7 = arith.maximumf %5, %6 : vector<32x128xf32>
    %8 = arith.truncf %7 : vector<32x128xf32> to vector<32x128xbf16>
    %c0_6 = arith.constant 0 : index
    %c0_7 = arith.constant 0 : index
    %9 = vector.load %arg4[%c0_6, %c0_7] : memref<32x128xbf16, #tpu.memory_space<vmem>>, vector<32x128xbf16>
    tpu.vector_store %arg4[%c0_6, %c0_7], %8 {strides = array<i32>} : memref<32x128xbf16, #tpu.memory_space<vmem>>, vector<32x128xbf16>,
    return
  }
  func.func @transform_0(%arg0: i32) -> (i32, i32) {
    %c0_i32 = arith.constant 0 : i32
    %c0_i32_0 = arith.constant 0 : i32
    return %arg0, %c0_i32 : i32, i32
  }
  func.func @transform_1(%arg0: i32) -> (i32, i32) {
    %c0_i32 = arith.constant 0 : i32
    %c0_i32_0 = arith.constant 0 : i32
    %c0_i32_1 = arith.constant 0 : i32
    return %c0_i32, %c0_i32_0 : i32, i32
  }
  func.func @transform_2(%arg0: i32) -> (i32, i32) {
    %c0_i32 = arith.constant 0 : i32
    %c0_i32_0 = arith.constant 0 : i32
    %c0_i32_1 = arith.constant 0 : i32
    return %c0_i32, %c0_i32_0 : i32, i32
  }
  func.func @transform_3(%arg0: i32) -> (i32, i32) {
    %c0_i32 = arith.constant 0 : i32
    %c0_i32_0 = arith.constant 0 : i32
    return %arg0, %c0_i32 : i32, i32
  }
}

module attributes {stable_mosaic.version = 11 : i64} {
  func.func @_linear_kernel(%arg0: i32, %arg1: memref<16x640xbf16, #tpu.memory_space<vmem>>, %arg2: memref<640x128xbf16, #tpu.memory_space<vmem>>, %arg3: memref<1x128xf32, #tpu.memory_space<vmem>>, %arg4: memref<16x128xbf16, #tpu.memory_space<vmem>>) attributes {dimension_semantics = [#tpu.dimension_semantics<parallel>], iteration_bounds = array<i64: 1>, scalar_prefetch = 0 : i64, scratch_operands = 0 : i64, tpu.core_type = #tpu.core_type<tc>, window_params = [{transform_indices = @transform_0, window_bounds = array<i64: 16, 640>}, {pipeline_mode = #tpu.pipeline_mode<synchronous>, transform_indices = @transform_1, window_bounds = array<i64: 640, 128>}, {pipeline_mode = #tpu.pipeline_mode<synchronous>, transform_indices = @transform_2, window_bounds = array<i64: 1, 128>}, {transform_indices = @transform_3, window_bounds = array<i64: 16, 128>}]} {
    %c0 = arith.constant 0 : index
    %c0_0 = arith.constant 0 : index
    %0 = vector.load %arg1[%c0, %c0_0] : memref<16x640xbf16, #tpu.memory_space<vmem>>, vector<16x640xbf16>
    %c0_1 = arith.constant 0 : index
    %c0_2 = arith.constant 0 : index
    %1 = vector.load %arg2[%c0_1, %c0_2] : memref<640x128xbf16, #tpu.memory_space<vmem>>, vector<640x128xbf16>
    %cst = arith.constant dense<0.000000e+00> : vector<16x128xf32>
    %2 = tpu.matmul %0, %1, %cst {dimension_numbers = #tpu.dot_dimension_numbers<[1], [0], [0], [1], [0, 0, 1, 1], [], []>} : vector<16x640xbf16>, vector<640x128xbf16>, vector<16x128xf32> -> vector<16x128xf32>
    %c0_3 = arith.constant 0 : index
    %c0_4 = arith.constant 0 : index
    %3 = vector.load %arg3[%c0_3, %c0_4] : memref<1x128xf32, #tpu.memory_space<vmem>>, vector<1x128xf32>
    %4 = vector.broadcast %3 : vector<1x128xf32> to vector<16x128xf32>
    %5 = arith.addf %2, %4 : vector<16x128xf32>
    %cst_5 = arith.constant 0.000000e+00 : f32
    %6 = vector.broadcast %cst_5 : f32 to vector<16x128xf32>
    %7 = arith.maximumf %5, %6 : vector<16x128xf32>
    %8 = arith.truncf %7 : vector<16x128xf32> to vector<16x128xbf16>
    %c0_6 = arith.constant 0 : index
    %c0_7 = arith.constant 0 : index
    %9 = vector.load %arg4[%c0_6, %c0_7] : memref<16x128xbf16, #tpu.memory_space<vmem>>, vector<16x128xbf16>
    tpu.vector_store %arg4[%c0_6, %c0_7], %8 {strides = array<i32>} : memref<16x128xbf16, #tpu.memory_space<vmem>>, vector<16x128xbf16>,
    return
  }
  func.func @transform_0(%arg0: i32) -> (i32, i32) {
    %c0_i32 = arith.constant 0 : i32
    %c0_i32_0 = arith.constant 0 : i32
    return %arg0, %c0_i32 : i32, i32
  }
  func.func @transform_1(%arg0: i32) -> (i32, i32) {
    %c0_i32 = arith.constant 0 : i32
    %c0_i32_0 = arith.constant 0 : i32
    %c0_i32_1 = arith.constant 0 : i32
    return %c0_i32, %c0_i32_0 : i32, i32
  }
  func.func @transform_2(%arg0: i32) -> (i32, i32) {
    %c0_i32 = arith.constant 0 : i32
    %c0_i32_0 = arith.constant 0 : i32
    %c0_i32_1 = arith.constant 0 : i32
    return %c0_i32, %c0_i32_0 : i32, i32
  }
  func.func @transform_3(%arg0: i32) -> (i32, i32) {
    %c0_i32 = arith.constant 0 : i32
    %c0_i32_0 = arith.constant 0 : i32
    return %arg0, %c0_i32 : i32, i32
  }
}

module attributes {stable_mosaic.version = 11 : i64} {
  func.func @_dueling_head_kernel(%arg0: i32, %arg1: memref<16x128xbf16, #tpu.memory_space<vmem>>, %arg2: memref<128x512xbf16, #tpu.memory_space<vmem>>, %arg3: memref<128x512xbf16, #tpu.memory_space<vmem>>, %arg4: memref<1x512xf32, #tpu.memory_space<vmem>>, %arg5: memref<1x512xf32, #tpu.memory_space<vmem>>, %arg6: memref<512x128xbf16, #tpu.memory_space<vmem>>, %arg7: memref<512x128xbf16, #tpu.memory_space<vmem>>, %arg8: memref<1x128xf32, #tpu.memory_space<vmem>>, %arg9: memref<16x128xf32, #tpu.memory_space<vmem>>) attributes {dimension_semantics = [#tpu.dimension_semantics<parallel>], iteration_bounds = array<i64: 1>, scalar_prefetch = 0 : i64, scratch_operands = 0 : i64, tpu.core_type = #tpu.core_type<tc>, window_params = [{transform_indices = @transform_0, window_bounds = array<i64: 16, 128>}, {pipeline_mode = #tpu.pipeline_mode<synchronous>, transform_indices = @transform_1, window_bounds = array<i64: 128, 512>}, {pipeline_mode = #tpu.pipeline_mode<synchronous>, transform_indices = @transform_2, window_bounds = array<i64: 128, 512>}, {pipeline_mode = #tpu.pipeline_mode<synchronous>, transform_indices = @transform_3, window_bounds = array<i64: 1, 512>}, {pipeline_mode = #tpu.pipeline_mode<synchronous>, transform_indices = @transform_4, window_bounds = array<i64: 1, 512>}, {pipeline_mode = #tpu.pipeline_mode<synchronous>, transform_indices = @transform_5, window_bounds = array<i64: 512, 128>}, {pipeline_mode = #tpu.pipeline_mode<synchronous>, transform_indices = @transform_6, window_bounds = array<i64: 512, 128>}, {pipeline_mode = #tpu.pipeline_mode<synchronous>, transform_indices = @transform_7, window_bounds = array<i64: 1, 128>}, {transform_indices = @transform_8, window_bounds = array<i64: 16, 128>}]} {
    %c0 = arith.constant 0 : index
    %c0_0 = arith.constant 0 : index
    %0 = vector.load %arg1[%c0, %c0_0] : memref<16x128xbf16, #tpu.memory_space<vmem>>, vector<16x128xbf16>
    %c0_1 = arith.constant 0 : index
    %c0_2 = arith.constant 0 : index
    %1 = vector.load %arg2[%c0_1, %c0_2] : memref<128x512xbf16, #tpu.memory_space<vmem>>, vector<128x512xbf16>
    %cst = arith.constant dense<0.000000e+00> : vector<16x512xf32>
    %2 = tpu.matmul %0, %1, %cst {dimension_numbers = #tpu.dot_dimension_numbers<[1], [0], [0], [1], [0, 0, 1, 1], [], []>} : vector<16x128xbf16>, vector<128x512xbf16>, vector<16x512xf32> -> vector<16x512xf32>
    %c0_3 = arith.constant 0 : index
    %c0_4 = arith.constant 0 : index
    %3 = vector.load %arg4[%c0_3, %c0_4] : memref<1x512xf32, #tpu.memory_space<vmem>>, vector<1x512xf32>
    %4 = vector.broadcast %3 : vector<1x512xf32> to vector<16x512xf32>
    %5 = arith.addf %2, %4 : vector<16x512xf32>
    %c0_5 = arith.constant 0 : index
    %c0_6 = arith.constant 0 : index
    %6 = vector.load %arg3[%c0_5, %c0_6] : memref<128x512xbf16, #tpu.memory_space<vmem>>, vector<128x512xbf16>
    %cst_7 = arith.constant dense<0.000000e+00> : vector<16x512xf32>
    %7 = tpu.matmul %0, %6, %cst_7 {dimension_numbers = #tpu.dot_dimension_numbers<[1], [0], [0], [1], [0, 0, 1, 1], [], []>} : vector<16x128xbf16>, vector<128x512xbf16>, vector<16x512xf32> -> vector<16x512xf32>
    %c0_8 = arith.constant 0 : index
    %c0_9 = arith.constant 0 : index
    %8 = vector.load %arg5[%c0_8, %c0_9] : memref<1x512xf32, #tpu.memory_space<vmem>>, vector<1x512xf32>
    %9 = vector.broadcast %8 : vector<1x512xf32> to vector<16x512xf32>
    %10 = arith.addf %7, %9 : vector<16x512xf32>
    %cst_10 = arith.constant 0.000000e+00 : f32
    %11 = vector.broadcast %cst_10 : f32 to vector<16x512xf32>
    %12 = arith.maximumf %5, %11 : vector<16x512xf32>
    %13 = arith.truncf %12 : vector<16x512xf32> to vector<16x512xbf16>
    %cst_11 = arith.constant 0.000000e+00 : f32
    %14 = vector.broadcast %cst_11 : f32 to vector<16x512xf32>
    %15 = arith.maximumf %10, %14 : vector<16x512xf32>
    %16 = arith.truncf %15 : vector<16x512xf32> to vector<16x512xbf16>
    %c0_12 = arith.constant 0 : index
    %c0_13 = arith.constant 0 : index
    %17 = vector.load %arg6[%c0_12, %c0_13] : memref<512x128xbf16, #tpu.memory_space<vmem>>, vector<512x128xbf16>
    %cst_14 = arith.constant dense<0.000000e+00> : vector<16x128xf32>
    %18 = tpu.matmul %13, %17, %cst_14 {dimension_numbers = #tpu.dot_dimension_numbers<[1], [0], [0], [1], [0, 0, 1, 1], [], []>} : vector<16x512xbf16>, vector<512x128xbf16>, vector<16x128xf32> -> vector<16x128xf32>
    %c0_15 = arith.constant 0 : index
    %c0_16 = arith.constant 0 : index
    %19 = vector.load %arg7[%c0_15, %c0_16] : memref<512x128xbf16, #tpu.memory_space<vmem>>, vector<512x128xbf16>
    %cst_17 = arith.constant dense<0.000000e+00> : vector<16x128xf32>
    %20 = tpu.matmul %16, %19, %cst_17 {dimension_numbers = #tpu.dot_dimension_numbers<[1], [0], [0], [1], [0, 0, 1, 1], [], []>} : vector<16x512xbf16>, vector<512x128xbf16>, vector<16x128xf32> -> vector<16x128xf32>
    %21 = arith.addf %18, %20 : vector<16x128xf32>
    %c0_18 = arith.constant 0 : index
    %c0_19 = arith.constant 0 : index
    %22 = vector.load %arg8[%c0_18, %c0_19] : memref<1x128xf32, #tpu.memory_space<vmem>>, vector<1x128xf32>
    %23 = vector.broadcast %22 : vector<1x128xf32> to vector<16x128xf32>
    %24 = arith.addf %21, %23 : vector<16x128xf32>
    %c0_20 = arith.constant 0 : index
    %c0_21 = arith.constant 0 : index
    %25 = vector.load %arg9[%c0_20, %c0_21] : memref<16x128xf32, #tpu.memory_space<vmem>>, vector<16x128xf32>
    tpu.vector_store %arg9[%c0_20, %c0_21], %24 {strides = array<i32>} : memref<16x128xf32, #tpu.memory_space<vmem>>, vector<16x128xf32>,
    return
  }
  func.func @transform_0(%arg0: i32) -> (i32, i32) {
    %c0_i32 = arith.constant 0 : i32
    %c0_i32_0 = arith.constant 0 : i32
    return %arg0, %c0_i32 : i32, i32
  }
  func.func @transform_1(%arg0: i32) -> (i32, i32) {
    %c0_i32 = arith.constant 0 : i32
    %c0_i32_0 = arith.constant 0 : i32
    %c0_i32_1 = arith.constant 0 : i32
    return %c0_i32, %c0_i32_0 : i32, i32
  }
  func.func @transform_2(%arg0: i32) -> (i32, i32) {
    %c0_i32 = arith.constant 0 : i32
    %c0_i32_0 = arith.constant 0 : i32
    %c0_i32_1 = arith.constant 0 : i32
    return %c0_i32, %c0_i32_0 : i32, i32
  }
  func.func @transform_3(%arg0: i32) -> (i32, i32) {
    %c0_i32 = arith.constant 0 : i32
    %c0_i32_0 = arith.constant 0 : i32
    %c0_i32_1 = arith.constant 0 : i32
    return %c0_i32, %c0_i32_0 : i32, i32
  }
  func.func @transform_4(%arg0: i32) -> (i32, i32) {
    %c0_i32 = arith.constant 0 : i32
    %c0_i32_0 = arith.constant 0 : i32
    %c0_i32_1 = arith.constant 0 : i32
    return %c0_i32, %c0_i32_0 : i32, i32
  }
  func.func @transform_5(%arg0: i32) -> (i32, i32) {
    %c0_i32 = arith.constant 0 : i32
    %c0_i32_0 = arith.constant 0 : i32
    %c0_i32_1 = arith.constant 0 : i32
    return %c0_i32, %c0_i32_0 : i32, i32
  }
  func.func @transform_6(%arg0: i32) -> (i32, i32) {
    %c0_i32 = arith.constant 0 : i32
    %c0_i32_0 = arith.constant 0 : i32
    %c0_i32_1 = arith.constant 0 : i32
    return %c0_i32, %c0_i32_0 : i32, i32
  }
  func.func @transform_7(%arg0: i32) -> (i32, i32) {
    %c0_i32 = arith.constant 0 : i32
    %c0_i32_0 = arith.constant 0 : i32
    %c0_i32_1 = arith.constant 0 : i32
    return %c0_i32, %c0_i32_0 : i32, i32
  }
  func.func @transform_8(%arg0: i32) -> (i32, i32) {
    %c0_i32 = arith.constant 0 : i32
    %c0_i32_0 = arith.constant 0 : i32
    return %arg0, %c0_i32 : i32, i32
  }
}

</mosaic_0001>

<bundles_post_ra>
// kernel: rainbow_forward.6
= control target key start
LH: loop header
LB: loop body
LE: loop exit
PB: predicated region body
PF: predicated region fallthrough
CT: control target
= control target key end

     0   :  { %s836_s1 = inlined_call_operand.vmem [shape: bf16[256,128], index: 1, kind: input, shape index: {}]   ;;  %s837_s0 = inlined_call_operand.vmem [shape: bf16[128,256], index: 0, kind: input, shape index: {}]   ;;  %s838_s2 = inlined_call_operand.vmem [shape: f32[1,128], index: 2, kind: input, shape index: {}]   ;;  %s839_s3 = inlined_call_operand.vmem [shape: bf16[128,128], index: 3, kind: output, shape index: {}]  }
   0x1   :  { %v635_v0 = vld [vmem:[%s836_s1 + $0x78] sm:$0xff]   ;;  %v637_v2 = vld [vmem:[%s836_s1 + $0x70] sm:$0xff]   ;;  %v639_v4 = vld [vmem:[%s836_s1 + $0x68] sm:$0xff]  }
   0x2   :  { %v636_v1 = vld [vmem:[%s836_s1 + $0x38] sm:$0xff]   ;;  %555 = vmatprep.subr.bf16.mxu0 %v635_v0  ;;  %619 = vmatprep.subr.bf16.mxu1 %v635_v0  ;;  %v638_v3 = vld [vmem:[%s836_s1 + $0x30] sm:$0xff]   ;;  %v640_v5 = vld [vmem:[%s836_s1 + $0x28] sm:$0xff]  }
   0x3   :  { %556 = vmatpush3.bf16.msra.mxu0 %v636_v1  ;;  %627 = vmatpush3.bf16.msra.mxu1 %v636_v1  ;;  %v641_v6 = vld [vmem:[%s836_s1 + $0x60] sm:$0xff]   ;;  %v643_v8 = vld [vmem:[%s836_s1 + $0x58] sm:$0xff]   ;;  %v645_v10 = vld [vmem:[%s836_s1 + $0x50] sm:$0xff]  }
   0x4   :  { %557 = vmatprep.subr.bf16.mxu0 %v637_v2  ;;  %620 = vmatprep.subr.bf16.mxu1 %v637_v2  ;;  %v642_v7 = vld [vmem:[%s836_s1 + $0x20] sm:$0xff]   ;;  %v644_v9 = vld [vmem:[%s836_s1 + $0x18] sm:$0xff]   ;;  %v646_v13 = vld [vmem:[%s836_s1 + $0x10] sm:$0xff]  }
   0x5   :  { %v653_v11 = vld [vmem:[%s837_s0 + $0x4] ss:$8 sps:$4 sm:$0xff]   ;;  %v651_v18 = vld [vmem:[%s837_s0] ss:$8 sps:$4 sm:$0xff]   ;;  %v657_v20 = vld [vmem:[%s837_s0 + $0x14] ss:$8 sps:$4 sm:$0xff]  }
   0x6   :  { %v656_v12 = vld [vmem:[%s837_s0 + $0x44] ss:$8 sps:$4 sm:$0xff]   ;;  %278 = vmatprep.mubr.bf16.mxu0 %v653_v11  ;;  %v654_v19 = vld [vmem:[%s837_s0 + $0x40] ss:$8 sps:$4 sm:$0xff]   ;;  %v659_v21 = vld [vmem:[%s837_s0 + $0x54] ss:$8 sps:$4 sm:$0xff]  }
   0x7   :  { %558 = vmatpush3.bf16.msra.mxu0 %v638_v3  ;;  %628 = vmatpush3.bf16.msra.mxu1 %v638_v3  ;;  %v647_v14 = vld [vmem:[%s836_s1 + $0x48] sm:$0xff]   ;;  %v649_v16 = vld [vmem:[%s836_s1 + $0x40] sm:$0xff]   ;;  %v661_v22 = vld [vmem:[%s837_s0 + $0x10] ss:$8 sps:$4 sm:$0xff]  }
   0x8   :  { %559 = vmatprep.subr.bf16.mxu0 %v639_v4  ;;  %621 = vmatprep.subr.bf16.mxu1 %v639_v4  ;;  %v648_v15 = vld [vmem:[%s836_s1 + $0x8] sm:$0xff]   ;;  %v650_v17 = vld [vmem:[%s836_s1] sm:$0xff]   ;;  %v662_v23 = vld [vmem:[%s837_s0 + $0x50] ss:$8 sps:$4 sm:$0xff]  }
   0x9   :  { %310 = vmatprep.mubr.bf16.mxu1 %v656_v12  ;;  %v663_v24 = vld [vmem:[%s837_s0 + $0x24] ss:$8 sps:$4 sm:$0xff]   ;;  %v667_v26 = vld [vmem:[%s837_s0 + $0x20] ss:$8 sps:$4 sm:$0xff]   ;;  %v669_v28 = vld [vmem:[%s837_s0 + $0x34] ss:$8 sps:$4 sm:$0xff]  }
   0xa   :  { %v665_v25 = vld [vmem:[%s837_s0 + $0x64] ss:$8 sps:$4 sm:$0xff]   ;;  %v668_v27 = vld [vmem:[%s837_s0 + $0x60] ss:$8 sps:$4 sm:$0xff]   ;;  %v671_v29 = vld [vmem:[%s837_s0 + $0x74] ss:$8 sps:$4 sm:$0xff]  }
   0xb   :  { %560 = vmatpush3.bf16.msra.mxu0 %v640_v5  ;;  %629 = vmatpush3.bf16.msra.mxu1 %v640_v5  ;;  %v673_v30 = vld [vmem:[%s837_s0 + $0x30] ss:$8 sps:$4 sm:$0xff]   ;;  %v794_v36 = vld [vmem:[%s838_s2] ss:$0 sm:$0xff] }
   0xc   :  { %561 = vmatprep.subr.bf16.mxu0 %v641_v6  ;;  %622 = vmatprep.subr.bf16.mxu1 %v641_v6  ;;  %v674_v31 = vld [vmem:[%s837_s0 + $0x70] ss:$8 sps:$4 sm:$0xff]  }
   0xf   :  { %562 = vmatpush3.bf16.msra.mxu0 %v642_v7  ;;  %630 = vmatpush3.bf16.msra.mxu1 %v642_v7 }
  0x10   :  { %563 = vmatprep.subr.bf16.mxu0 %v643_v8  ;;  %623 = vmatprep.subr.bf16.mxu1 %v643_v8 }
  0x13   :  { %564 = vmatpush3.bf16.msra.mxu0 %v644_v9  ;;  %631 = vmatpush3.bf16.msra.mxu1 %v644_v9 }
  0x14   :  { %565 = vmatprep.subr.bf16.mxu0 %v645_v10  ;;  %624 = vmatprep.subr.bf16.mxu1 %v645_v10 }
  0x17   :  { %566 = vmatpush3.bf16.msra.mxu0 %v646_v13  ;;  %632 = vmatpush3.bf16.msra.mxu1 %v646_v13 }
  0x18   :  { %567 = vmatprep.subr.bf16.mxu0 %v647_v14  ;;  %625 = vmatprep.subr.bf16.mxu1 %v647_v14 }
  0x1b   :  { %568 = vmatpush3.bf16.msra.mxu0 %v648_v15  ;;  %633 = vmatpush3.bf16.msra.mxu1 %v648_v15 }
  0x1c   :  { %569 = vmatprep.subr.bf16.mxu0 %v649_v16  ;;  %626 = vmatprep.subr.bf16.mxu1 %v649_v16 }
  0x1f   :  { %570 = vmatpush3.bf16.msra.mxu0 %v650_v17  ;;  %634 = vmatpush3.bf16.msra.mxu1 %v650_v17 }
  0x22   :  { %279 = vmatmul.mubr.bf16.vlgmr.msra.gmra.mxu0 %v651_v18  ;;  %311 = vmatmul.mubr.bf16.vlgmr.msra.gmra.mxu1 %v654_v19 }
  0x23   :  { %286 = vmatprep.mubr.bf16.mxu0 %v657_v20  ;;  %318 = vmatprep.mubr.bf16.mxu1 %v659_v21 }
  0x2a   :  { %287 = vmatmul.mubr.bf16.gmra.mxu0 %v661_v22  ;;  %319 = vmatmul.mubr.bf16.gmra.mxu1 %v662_v23 }
  0x2b   :  { %294 = vmatprep.mubr.bf16.mxu0 %v663_v24  ;;  %326 = vmatprep.mubr.bf16.mxu1 %v665_v25 }
  0x32   :  { %295 = vmatmul.mubr.bf16.gmra.mxu0 %v667_v26  ;;  %327 = vmatmul.mubr.bf16.gmra.mxu1 %v668_v27 }
  0x33   :  { %302 = vmatprep.mubr.bf16.mxu0 %v669_v28  ;;  %334 = vmatprep.mubr.bf16.mxu1 %v671_v29 }
  0x3a   :  { %303 = vmatmul.mubr.bf16.gmra.mxu0 %v673_v30  ;;  %335 = vmatmul.mubr.bf16.gmra.mxu1 %v674_v31 }
  0xe2   :  { %v571_v32 = vpop.f32.mrf.mxu0  ;;  %v595_v33 = vpop.f32.mrf.mxu1 }
  0xe4   :  { %v572_v34 = vpop.f32.mrf.mxu0  ;;  %v596_v35 = vpop.f32.mrf.mxu1 }
  0xe5   :  { %v573_v37 = vadd.f32 %v572_v34, %v571_v32  ;;  %v597_v38 = vadd.f32 %v596_v35, %v595_v33 }
  0xe6   :  { %v574_v39 = vpop.f32.mrf.mxu0  ;;  %v598_v40 = vpop.f32.mrf.mxu1 }
  0xe7   :  { %v281_v41 = vadd.f32 %v573_v37, %v794_v36  ;;  %v313_v42 = vadd.f32 %v597_v38, %v794_v36 }
  0xe8   :  { %v575_v43 = vpop.f32.mrf.mxu0  ;;  %v599_v44 = vpop.f32.mrf.mxu1 }
  0xe9   :  { %v576_v45 = vadd.f32 %v575_v43, %v574_v39  ;;  %v600_v46 = vadd.f32 %v599_v44, %v598_v40  ;;  %v343_v51 = vmax.f32 %v281_v41, 0.0  ;;  %v351_v52 = vmax.f32 %v313_v42, 0.0 }
  0xea   :  { %v577_v47 = vpop.f32.mrf.mxu0  ;;  %v601_v48 = vpop.f32.mrf.mxu1 }
  0xeb   :  { %v284_v49 = vadd.f32 %v576_v45, %v794_v36  ;;  %v316_v50 = vadd.f32 %v600_v46, %v794_v36 }
  0xec   :  { %v578_v53 = vpop.f32.mrf.mxu0  ;;  %v602_v54 = vpop.f32.mrf.mxu1 }
  0xed   :  { %v344_v55 = vmax.f32 %v284_v49, 0.0  ;;  %v352_v56 = vmax.f32 %v316_v50, 0.0  ;;  %v579_v57 = vadd.f32 %v578_v53, %v577_v47  ;;  %v603_v58 = vadd.f32 %v602_v54, %v601_v48 }
  0xee   :  { %v580_v59 = vpop.f32.mrf.mxu0  ;;  %v604_v60 = vpop.f32.mrf.mxu1 }
  0xef   :  { %v511_v61 = vpack.c.bf16 %v344_v55, %v343_v51  ;;  %v531_v62 = vpack.c.bf16 %v352_v56, %v351_v52  ;;  %v289_v63 = vadd.f32 %v579_v57, %v794_v36  ;;  %v321_v0 = vadd.f32 %v603_v58, %v794_v36 }
  0xf0   :  { %v581_v1 = vpop.f32.mrf.mxu0  ;;  %v605_v2 = vpop.f32.mrf.mxu1 }
  0xf1   :  { %512 = vst [vmem:[%s839_s3] sm:$0xff] %v511_v61   ;;  %551 = vst [vmem:[%s839_s3 + $0x20] sm:$0xff] %v531_v62   ;;  %v582_v3 = vadd.f32 %v581_v1, %v580_v59  ;;  %v606_v4 = vadd.f32 %v605_v2, %v604_v60  ;;  %v345_v9 = vmax.f32 %v289_v63, 0.0  ;;  %v353_v10 = vmax.f32 %v321_v0, 0.0 }
  0xf2   :  { %v583_v5 = vpop.f32.mrf.mxu0  ;;  %v607_v6 = vpop.f32.mrf.mxu1 }
  0xf3   :  { %v292_v7 = vadd.f32 %v582_v3, %v794_v36  ;;  %v324_v8 = vadd.f32 %v606_v4, %v794_v36 }
  0xf4   :  { %v584_v11 = vpop.f32.mrf.mxu0  ;;  %v608_v12 = vpop.f32.mrf.mxu1 }
  0xf5   :  { %v346_v13 = vmax.f32 %v292_v7, 0.0  ;;  %v354_v14 = vmax.f32 %v324_v8, 0.0  ;;  %v585_v15 = vadd.f32 %v584_v11, %v583_v5  ;;  %v609_v16 = vadd.f32 %v608_v12, %v607_v6 }
  0xf6   :  { %v586_v17 = vpop.f32.mrf.mxu0  ;;  %v610_v18 = vpop.f32.mrf.mxu1 }
  0xf7   :  { %v516_v19 = vpack.c.bf16 %v346_v13, %v345_v9  ;;  %v536_v20 = vpack.c.bf16 %v354_v14, %v353_v10  ;;  %v297_v21 = vadd.f32 %v585_v15, %v794_v36  ;;  %v329_v22 = vadd.f32 %v609_v16, %v794_v36 }
  0xf8   :  { %v587_v23 = vpop.f32.mrf.mxu0  ;;  %v611_v24 = vpop.f32.mrf.mxu1 }
  0xf9   :  { %548 = vst [vmem:[%s839_s3 + $0x8] sm:$0xff] %v516_v19   ;;  %552 = vst [vmem:[%s839_s3 + $0x28] sm:$0xff] %v536_v20   ;;  %v588_v25 = vadd.f32 %v587_v23, %v586_v17  ;;  %v612_v26 = vadd.f32 %v611_v24, %v610_v18  ;;  %v347_v31 = vmax.f32 %v297_v21, 0.0  ;;  %v355_v32 = vmax.f32 %v329_v22, 0.0 }
  0xfa   :  { %v589_v27 = vpop.f32.mrf.mxu0  ;;  %v613_v28 = vpop.f32.mrf.mxu1 }
  0xfb   :  { %v300_v29 = vadd.f32 %v588_v25, %v794_v36  ;;  %v332_v30 = vadd.f32 %v612_v26, %v794_v36 }
  0xfc   :  { %v590_v33 = vpop.f32.mrf.mxu0  ;;  %v614_v34 = vpop.f32.mrf.mxu1 }
  0xfd   :  { %v348_v35 = vmax.f32 %v300_v29, 0.0  ;;  %v356_v37 = vmax.f32 %v332_v30, 0.0  ;;  %v591_v38 = vadd.f32 %v590_v33, %v589_v27  ;;  %v615_v39 = vadd.f32 %v614_v34, %v613_v28 }
  0xfe   :  { %v592_v40 = vpop.f32.mrf.mxu0  ;;  %v616_v41 = vpop.f32.mrf.mxu1 }
  0xff   :  { %v521_v42 = vpack.c.bf16 %v348_v35, %v347_v31  ;;  %v541_v43 = vpack.c.bf16 %v356_v37, %v355_v32  ;;  %v305_v46 = vadd.f32 %v591_v38, %v794_v36  ;;  %v337_v47 = vadd.f32 %v615_v39, %v794_v36 }
 0x100   :  { %v593_v44 = vpop.f32.mrf.mxu0  ;;  %v617_v45 = vpop.f32.mrf.mxu1 }
 0x101   :  { %549 = vst [vmem:[%s839_s3 + $0x10] sm:$0xff] %v521_v42   ;;  %553 = vst [vmem:[%s839_s3 + $0x30] sm:$0xff] %v541_v43   ;;  %v594_v48 = vadd.f32 %v593_v44, %v592_v40  ;;  %v618_v49 = vadd.f32 %v617_v45, %v616_v41  ;;  %v349_v52 = vmax.f32 %v305_v46, 0.0  ;;  %v357_v53 = vmax.f32 %v337_v47, 0.0 }
 0x103   :  { %v308_v50 = vadd.f32 %v594_v48, %v794_v36  ;;  %v340_v51 = vadd.f32 %v618_v49, %v794_v36 }
 0x105   :  { %v350_v54 = vmax.f32 %v308_v50, 0.0  ;;  %v358_v55 = vmax.f32 %v340_v51, 0.0 }
 0x107   :  { %v526_v56 = vpack.c.bf16 %v350_v54, %v349_v52  ;;  %v546_v57 = vpack.c.bf16 %v358_v55, %v357_v53 }
 0x109   :  { %550 = vst [vmem:[%s839_s3 + $0x18] sm:$0xff] %v526_v56   ;;  %554 = vst [vmem:[%s839_s3 + $0x38] sm:$0xff] %v546_v57  }

// kernel: rainbow_forward.7
= control target key start
LH: loop header
LB: loop body
LE: loop exit
PB: predicated region body
PF: predicated region fallthrough
CT: control target
= control target key end

     0   :  { %s761_s1 = inlined_call_operand.vmem [shape: bf16[512,128], index: 1, kind: input, shape index: {}]   ;;  %s762_s0 = inlined_call_operand.vmem [shape: bf16[32,512], index: 0, kind: input, shape index: {}]   ;;  %s763_s2 = inlined_call_operand.vmem [shape: f32[1,128], index: 2, kind: input, shape index: {}]   ;;  %s764_s3 = inlined_call_operand.vmem [shape: bf16[32,128], index: 3, kind: output, shape index: {}]  }
   0x1   :  { %v568_v0 = vld [vmem:[%s761_s1 + $0x78] sm:$0xff]   ;;  %v572_v4 = vld [vmem:[%s761_s1 + $0x70] sm:$0xff]   ;;  %v576_v8 = vld [vmem:[%s761_s1 + $0x68] sm:$0xff]  }
   0x2   :  { %v569_v1 = vld [vmem:[%s761_s1 + $0xf8] sm:$0xff]   ;;  %512 = vmatprep.subr.bf16.mxu0 %v568_v0  ;;  %v573_v5 = vld [vmem:[%s761_s1 + $0xf0] sm:$0xff]   ;;  %v577_v9 = vld [vmem:[%s761_s1 + $0xe8] sm:$0xff]  }
   0x3   :  { %v570_v2 = vld [vmem:[%s761_s1 + $0x38] sm:$0xff]   ;;  %540 = vmatprep.subr.bf16.mxu1 %v569_v1  ;;  %v574_v6 = vld [vmem:[%s761_s1 + $0x30] sm:$0xff]   ;;  %v578_v10 = vld [vmem:[%s761_s1 + $0x28] sm:$0xff]  }
   0x4   :  { %v571_v3 = vld [vmem:[%s761_s1 + $0xb8] sm:$0xff]   ;;  %513 = vmatpush3.bf16.msra.mxu0 %v570_v2  ;;  %v575_v7 = vld [vmem:[%s761_s1 + $0xb0] sm:$0xff]   ;;  %v579_v11 = vld [vmem:[%s761_s1 + $0xa8] sm:$0xff]  }
   0x5   :  { %541 = vmatpush3.bf16.msra.mxu1 %v571_v3  ;;  %514 = vmatprep.subr.bf16.mxu0 %v572_v4  ;;  %v580_v12 = vld [vmem:[%s761_s1 + $0x60] sm:$0xff]   ;;  %v584_v16 = vld [vmem:[%s761_s1 + $0x58] sm:$0xff]   ;;  %v588_v20 = vld [vmem:[%s761_s1 + $0x50] sm:$0xff]  }
   0x6   :  { %542 = vmatprep.subr.bf16.mxu1 %v573_v5  ;;  %v581_v13 = vld [vmem:[%s761_s1 + $0xe0] sm:$0xff]   ;;  %v585_v17 = vld [vmem:[%s761_s1 + $0xd8] sm:$0xff]   ;;  %v589_v21 = vld [vmem:[%s761_s1 + $0xd0] sm:$0xff]  }
   0x7   :  { %v582_v14 = vld [vmem:[%s761_s1 + $0x20] sm:$0xff]   ;;  %v586_v18 = vld [vmem:[%s761_s1 + $0x18] sm:$0xff]   ;;  %v590_v22 = vld [vmem:[%s761_s1 + $0x10] sm:$0xff]  }
   0x8   :  { %515 = vmatpush3.bf16.msra.mxu0 %v574_v6  ;;  %v583_v15 = vld [vmem:[%s761_s1 + $0xa0] sm:$0xff]   ;;  %v587_v19 = vld [vmem:[%s761_s1 + $0x98] sm:$0xff]   ;;  %v591_v23 = vld [vmem:[%s761_s1 + $0x90] sm:$0xff]  }
   0x9   :  { %543 = vmatpush3.bf16.msra.mxu1 %v575_v7  ;;  %516 = vmatprep.subr.bf16.mxu0 %v576_v8  ;;  %v592_v24 = vld [vmem:[%s761_s1 + $0x48] sm:$0xff]   ;;  %v596_v28 = vld [vmem:[%s761_s1 + $0x40] sm:$0xff]  }
   0xa   :  { %544 = vmatprep.subr.bf16.mxu1 %v577_v9  ;;  %v593_v25 = vld [vmem:[%s761_s1 + $0xc8] sm:$0xff]   ;;  %v597_v29 = vld [vmem:[%s761_s1 + $0xc0] sm:$0xff]  }
   0xb   :  { %v594_v26 = vld [vmem:[%s761_s1 + $0x8] sm:$0xff]   ;;  %v598_v30 = vld [vmem:[%s761_s1] sm:$0xff]  }
   0xc   :  { %517 = vmatpush3.bf16.msra.mxu0 %v578_v10  ;;  %v595_v27 = vld [vmem:[%s761_s1 + $0x88] sm:$0xff]   ;;  %v599_v31 = vld [vmem:[%s761_s1 + $0x80] sm:$0xff]  }
   0xd   :  { %545 = vmatpush3.bf16.msra.mxu1 %v579_v11  ;;  %518 = vmatprep.subr.bf16.mxu0 %v580_v12  ;;  %v600_v32 = vld [vmem:[%s762_s0] ss:$16 sps:$4 sm:$0xff]   ;;  %v602_v33 = vld [vmem:[%s762_s0 + $0x4] ss:$16 sps:$4 sm:$0xff]   ;;  %v603_v34 = vld [vmem:[%s762_s0 + $0x8] ss:$16 sps:$4 sm:$0xff]  }
   0xe   :  { %546 = vmatprep.subr.bf16.mxu1 %v581_v13  ;;  %v605_v35 = vld [vmem:[%s762_s0 + $0xc] ss:$16 sps:$4 sm:$0xff]   ;;  %358 = vmatprep.mubr.bf16.mxu0 %v602_v33  ;;  %v606_v36 = vld [vmem:[%s762_s0 + $0x24] ss:$16 sps:$4 sm:$0xff]   ;;  %v610_v38 = vld [vmem:[%s762_s0 + $0x20] ss:$16 sps:$4 sm:$0xff]  }
   0xf   :  { %407 = vmatprep.mubr.bf16.mxu1 %v605_v35  ;;  %v608_v37 = vld [vmem:[%s762_s0 + $0x2c] ss:$16 sps:$4 sm:$0xff]   ;;  %v611_v39 = vld [vmem:[%s762_s0 + $0x28] ss:$16 sps:$4 sm:$0xff]   ;;  %v452_v42 = vld [vmem:[%s763_s2] ss:$0 sm:$0xff] }
  0x10   :  { %519 = vmatpush3.bf16.msra.mxu0 %v582_v14 }
  0x11   :  { %547 = vmatpush3.bf16.msra.mxu1 %v583_v15  ;;  %520 = vmatprep.subr.bf16.mxu0 %v584_v16 }
  0x12   :  { %548 = vmatprep.subr.bf16.mxu1 %v585_v17 }
  0x14   :  { %521 = vmatpush3.bf16.msra.mxu0 %v586_v18 }
  0x15   :  { %549 = vmatpush3.bf16.msra.mxu1 %v587_v19  ;;  %522 = vmatprep.subr.bf16.mxu0 %v588_v20 }
  0x16   :  { %550 = vmatprep.subr.bf16.mxu1 %v589_v21 }
  0x18   :  { %523 = vmatpush3.bf16.msra.mxu0 %v590_v22 }
  0x19   :  { %551 = vmatpush3.bf16.msra.mxu1 %v591_v23  ;;  %524 = vmatprep.subr.bf16.mxu0 %v592_v24 }
  0x1a   :  { %552 = vmatprep.subr.bf16.mxu1 %v593_v25 }
  0x1c   :  { %525 = vmatpush3.bf16.msra.mxu0 %v594_v26 }
  0x1d   :  { %553 = vmatpush3.bf16.msra.mxu1 %v595_v27  ;;  %526 = vmatprep.subr.bf16.mxu0 %v596_v28 }
  0x1e   :  { %554 = vmatprep.subr.bf16.mxu1 %v597_v29 }
  0x20   :  { %527 = vmatpush3.bf16.msra.mxu0 %v598_v30 }
  0x21   :  { %555 = vmatpush3.bf16.msra.mxu1 %v599_v31 }
  0x23   :  { %359 = vmatmul.mubr.bf16.vlgmr.msra.gmra.mxu0 %v600_v32 }
  0x24   :  { %408 = vmatmul.mubr.bf16.vlgmr.msra.gmra.mxu1 %v603_v34  ;;  %366 = vmatprep.mubr.bf16.mxu0 %v606_v36 }
  0x25   :  { %415 = vmatprep.mubr.bf16.mxu1 %v608_v37 }
  0x2b   :  { %367 = vmatmul.mubr.bf16.gmra.mxu0 %v610_v38 }
  0x2c   :  { %416 = vmatmul.mubr.bf16.gmra.mxu1 %v611_v39 }
  0xe3   :  { %v528_v40 = vpop.f32.mrf.mxu0 }
  0xe4   :  { %v556_v41 = vpop.f32.mrf.mxu1 }
  0xe5   :  { %v529_v43 = vpop.f32.mrf.mxu0 }
  0xe6   :  { %v530_v44 = vadd.f32 %v529_v43, %v528_v40  ;;  %v557_v45 = vpop.f32.mrf.mxu1 }
  0xe7   :  { %v531_v46 = vpop.f32.mrf.mxu0  ;;  %v558_v50 = vadd.f32 %v557_v45, %v556_v41 }
  0xe8   :  { %v361_v47 = vadd.f32 %v530_v44, %v452_v42  ;;  %v559_v48 = vpop.f32.mrf.mxu1 }
  0xe9   :  { %v532_v49 = vpop.f32.mrf.mxu0 }
  0xea   :  { %v533_v51 = vadd.f32 %v532_v49, %v531_v46  ;;  %v560_v52 = vpop.f32.mrf.mxu1  ;;  %v410_v54 = vadd.f32 %v558_v50, %v361_v47 }
  0xeb   :  { %v534_v53 = vpop.f32.mrf.mxu0  ;;  %v561_v56 = vadd.f32 %v560_v52, %v559_v48 }
  0xec   :  { %v364_v55 = vadd.f32 %v533_v51, %v452_v42  ;;  %v562_v57 = vpop.f32.mrf.mxu1  ;;  %v424_v63 = vmax.f32 %v410_v54, 0.0 }
  0xed   :  { %v535_v58 = vpop.f32.mrf.mxu0 }
  0xee   :  { %v413_v59 = vadd.f32 %v561_v56, %v364_v55  ;;  %v536_v60 = vadd.f32 %v535_v58, %v534_v53  ;;  %v563_v61 = vpop.f32.mrf.mxu1 }
  0xef   :  { %v537_v62 = vpop.f32.mrf.mxu0  ;;  %v564_v5 = vadd.f32 %v563_v61, %v562_v57 }
  0xf0   :  { %v425_v0 = vmax.f32 %v413_v59, 0.0  ;;  %v369_v1 = vadd.f32 %v536_v60, %v452_v42  ;;  %v565_v2 = vpop.f32.mrf.mxu1 }
  0xf1   :  { %v538_v3 = vpop.f32.mrf.mxu0 }
  0xf2   :  { %v504_v4 = vpack.c.bf16 %v425_v0, %v424_v63  ;;  %v539_v6 = vadd.f32 %v538_v3, %v537_v62  ;;  %v566_v7 = vpop.f32.mrf.mxu1  ;;  %v418_v8 = vadd.f32 %v564_v5, %v369_v1 }
  0xf3   :  { %v567_v10 = vadd.f32 %v566_v7, %v565_v2 }
  0xf4   :  { %505 = vst [vmem:[%s764_s3] sm:$0xff] %v504_v4   ;;  %v372_v9 = vadd.f32 %v539_v6, %v452_v42  ;;  %v426_v12 = vmax.f32 %v418_v8, 0.0 }
  0xf6   :  { %v421_v11 = vadd.f32 %v567_v10, %v372_v9 }
  0xf8   :  { %v427_v13 = vmax.f32 %v421_v11, 0.0 }
  0xfa   :  { %v509_v14 = vpack.c.bf16 %v427_v13, %v426_v12 }
  0xfc   :  { %511 = vst [vmem:[%s764_s3 + $0x8] sm:$0xff] %v509_v14  }

// kernel: rainbow_forward.8
= control target key start
LH: loop header
LB: loop body
LE: loop exit
PB: predicated region body
PF: predicated region fallthrough
CT: control target
= control target key end

     0   :  { %v690_v33 = vmov 0.0   ;;  %vm691_vm0 = vmmov 0   ;;  %s853_s1 = inlined_call_operand.vmem [shape: bf16[640,128], index: 1, kind: input, shape index: {}]   ;;  %s854_s0 = inlined_call_operand.vmem [shape: bf16[16,640], index: 0, kind: input, shape index: {}]   ;;  %s855_s2 = inlined_call_operand.vmem [shape: f32[1,128], index: 2, kind: input, shape index: {}]   ;;  %s856_s3 = inlined_call_operand.vmem [shape: bf16[16,128], index: 3, kind: output, shape index: {}]  }
   0x1   :  { %v643_v0 = vld [vmem:[%s853_s1 + $0x78] sm:$0xff]   ;;  %v647_v4 = vld [vmem:[%s853_s1 + $0x70] sm:$0xff]   ;;  %v651_v8 = vld [vmem:[%s853_s1 + $0x68] sm:$0xff]  }
   0x2   :  { %v644_v1 = vld [vmem:[%s853_s1 + $0x38] sm:$0xff]   ;;  %568 = vmatprep.subr.bf16.mxu0 %v643_v0  ;;  %v648_v5 = vld [vmem:[%s853_s1 + $0x30] sm:$0xff]   ;;  %v652_v9 = vld [vmem:[%s853_s1 + $0x28] sm:$0xff]  }
   0x3   :  { %v645_v2 = vld [vmem:[%s853_s1 + $0xf8] sm:$0xff]   ;;  %569 = vmatpush3.bf16.msra.mxu0 %v644_v1  ;;  %v649_v6 = vld [vmem:[%s853_s1 + $0xf0] sm:$0xff]   ;;  %v653_v10 = vld [vmem:[%s853_s1 + $0xe8] sm:$0xff]  }
   0x4   :  { %v646_v3 = vld [vmem:[%s853_s1 + $0xb8] sm:$0xff]   ;;  %590 = vmatprep.subr.bf16.mxu1 %v645_v2  ;;  %570 = vmatprep.subr.bf16.mxu0 %v647_v4  ;;  %v650_v7 = vld [vmem:[%s853_s1 + $0xb0] sm:$0xff]   ;;  %v654_v11 = vld [vmem:[%s853_s1 + $0xa8] sm:$0xff]  }
   0x5   :  { %591 = vmatpush3.bf16.msra.mxu1 %v646_v3  ;;  %v655_v12 = vld [vmem:[%s853_s1 + $0x60] sm:$0xff]   ;;  %v659_v16 = vld [vmem:[%s853_s1 + $0x58] sm:$0xff]   ;;  %v663_v20 = vld [vmem:[%s853_s1 + $0x50] sm:$0xff]  }
   0x6   :  { %592 = vmatprep.subr.bf16.mxu1 %v649_v6  ;;  %v656_v13 = vld [vmem:[%s853_s1 + $0x20] sm:$0xff]   ;;  %v660_v17 = vld [vmem:[%s853_s1 + $0x18] sm:$0xff]   ;;  %v664_v21 = vld [vmem:[%s853_s1 + $0x10] sm:$0xff]  }
   0x7   :  { %571 = vmatpush3.bf16.msra.mxu0 %v648_v5  ;;  %v657_v14 = vld [vmem:[%s853_s1 + $0xe0] sm:$0xff]   ;;  %v661_v18 = vld [vmem:[%s853_s1 + $0xd8] sm:$0xff]   ;;  %v665_v22 = vld [vmem:[%s853_s1 + $0xd0] sm:$0xff]  }
   0x8   :  { %572 = vmatprep.subr.bf16.mxu0 %v651_v8  ;;  %v658_v15 = vld [vmem:[%s853_s1 + $0xa0] sm:$0xff]   ;;  %v662_v19 = vld [vmem:[%s853_s1 + $0x98] sm:$0xff]   ;;  %v666_v23 = vld [vmem:[%s853_s1 + $0x90] sm:$0xff]  }
   0x9   :  { %593 = vmatpush3.bf16.msra.mxu1 %v650_v7  ;;  %v667_v24 = vld [vmem:[%s853_s1 + $0x48] sm:$0xff]   ;;  %v671_v28 = vld [vmem:[%s853_s1 + $0x40] sm:$0xff]   ;;  %v681_v37 = vld [vmem:[%s853_s1 + $0x138] sm:$0xff]  }
   0xa   :  { %594 = vmatprep.subr.bf16.mxu1 %v653_v10  ;;  %v668_v25 = vld [vmem:[%s853_s1 + $0x8] sm:$0xff]   ;;  %v672_v29 = vld [vmem:[%s853_s1] sm:$0xff]   ;;  %v682_v38 = vld [vmem:[%s853_s1 + $0x130] sm:$0xff]  }
   0xb   :  { %573 = vmatpush3.bf16.msra.mxu0 %v652_v9  ;;  %v669_v26 = vld [vmem:[%s853_s1 + $0xc8] sm:$0xff]   ;;  %v673_v30 = vld [vmem:[%s853_s1 + $0xc0] sm:$0xff]   ;;  %v685_v41 = vld [vmem:[%s853_s1 + $0x118] sm:$0xff]  }
   0xc   :  { %574 = vmatprep.subr.bf16.mxu0 %v655_v12  ;;  %v670_v27 = vld [vmem:[%s853_s1 + $0x88] sm:$0xff]   ;;  %v674_v31 = vld [vmem:[%s854_s0] ss:$20 sps:$4 sm:$0xff]   ;;  %v676_v32 = vld [vmem:[%s854_s0 + $0x4] ss:$20 sps:$4 sm:$0xff]  }
   0xd   :  { %595 = vmatpush3.bf16.msra.mxu1 %v654_v11  ;;  %v677_v34 = vld [vmem:[%s853_s1 + $0x80] sm:$0xff]   ;;  %406 = vmatprep.mubr.bf16.mxu0 %v676_v32  ;;  %v678_v35 = vld [vmem:[%s854_s0 + $0x8] ss:$20 sps:$4 sm:$0xff]   ;;  %v686_v42 = vld [vmem:[%s853_s1 + $0x110] sm:$0xff]  }
   0xe   :  { %596 = vmatprep.subr.bf16.mxu1 %v657_v14  ;;  %v680_v36 = vld [vmem:[%s854_s0 + $0xc] ss:$20 sps:$4 sm:$0xff]   ;;  %v689_v45 = vld [vmem:[%s854_s0 + $0x10] ss:$20 sps:$4 sm:$0xff]  }
   0xf   :  { %575 = vmatpush3.bf16.msra.mxu0 %v656_v13  ;;  %447 = vmatprep.mubr.bf16.mxu1 %v680_v36  ;;  %v683_v39 = vld [vmem:[%s853_s1 + $0x128] sm:$0xff]   ;;  %v684_v40 = vld [vmem:[%s853_s1 + $0x120] sm:$0xff]  }
  0x10   :  { %576 = vmatprep.subr.bf16.mxu0 %v659_v16  ;;  %v687_v43 = vld [vmem:[%s853_s1 + $0x108] sm:$0xff]   ;;  %v688_v44 = vld [vmem:[%s853_s1 + $0x100] sm:$0xff]  }
  0x11   :  { %597 = vmatpush3.bf16.msra.mxu1 %v658_v15  ;;  %v513_v54 = vld [vmem:[%s855_s2] ss:$0 sm:$0xff] }
  0x12   :  { %598 = vmatprep.subr.bf16.mxu1 %v661_v18 }
  0x13   :  { %577 = vmatpush3.bf16.msra.mxu0 %v660_v17 }
  0x14   :  { %578 = vmatprep.subr.bf16.mxu0 %v663_v20 }
  0x15   :  { %599 = vmatpush3.bf16.msra.mxu1 %v662_v19 }
  0x16   :  { %600 = vmatprep.subr.bf16.mxu1 %v665_v22 }
  0x17   :  { %579 = vmatpush3.bf16.msra.mxu0 %v664_v21 }
  0x18   :  { %580 = vmatprep.subr.bf16.mxu0 %v667_v24 }
  0x19   :  { %601 = vmatpush3.bf16.msra.mxu1 %v666_v23 }
  0x1a   :  { %602 = vmatprep.subr.bf16.mxu1 %v669_v26 }
  0x1b   :  { %581 = vmatpush3.bf16.msra.mxu0 %v668_v25 }
  0x1c   :  { %582 = vmatprep.subr.bf16.mxu0 %v671_v28 }
  0x1d   :  { %603 = vmatpush3.bf16.msra.mxu1 %v670_v27 }
  0x1e   :  { %604 = vmatprep.subr.bf16.mxu1 %v673_v30 }
  0x1f   :  { %583 = vmatpush3.bf16.msra.mxu0 %v672_v29 }
  0x20   :  { %621 = vmatprep.subr.bf16.mxu0 %v690_v33 }
  0x21   :  { %605 = vmatpush3.bf16.msra.mxu1 %v677_v34 }
  0x22   :  { %407 = vmatmul.mubr.bf16.vlgmr.msra.gmra.mxu0 %v674_v31 }
  0x23   :  { %637 = vmatprep.mubr.msk.bf16.mxu0 %vm691_vm0, %v690_v33  ;;  %622 = vmatpush3.bf16.msra.mxu0 %v681_v37 }
  0x24   :  { %448 = vmatmul.mubr.bf16.vlgmr.msra.gmra.mxu1 %v678_v35  ;;  %623 = vmatprep.subr.bf16.mxu0 %v690_v33 }
  0x27   :  { %624 = vmatpush3.bf16.msra.mxu0 %v682_v38 }
  0x28   :  { %625 = vmatprep.subr.bf16.mxu0 %v690_v33 }
  0x2b   :  { %626 = vmatpush3.bf16.msra.mxu0 %v683_v39 }
  0x2c   :  { %627 = vmatprep.subr.bf16.mxu0 %v690_v33 }
  0x2f   :  { %628 = vmatpush3.bf16.msra.mxu0 %v684_v40 }
  0x30   :  { %629 = vmatprep.subr.bf16.mxu0 %v690_v33 }
  0x33   :  { %630 = vmatpush3.bf16.msra.mxu0 %v685_v41 }
  0x34   :  { %631 = vmatprep.subr.bf16.mxu0 %v690_v33 }
  0x37   :  { %632 = vmatpush3.bf16.msra.mxu0 %v686_v42 }
  0x38   :  { %633 = vmatprep.subr.bf16.mxu0 %v690_v33 }
  0x3b   :  { %634 = vmatpush3.bf16.msra.mxu0 %v687_v43 }
  0x3c   :  { %635 = vmatprep.subr.bf16.mxu0 %v690_v33 }
  0x3f   :  { %636 = vmatpush3.bf16.msra.mxu0 %v688_v44 }
  0x42   :  { %638 = vmatmul.mubr.bf16.vlgmr.msra.gmra.mxu0 %v689_v45 }
  0xe2   :  { %v584_v46 = vpop.f32.mrf.mxu0 }
  0xe4   :  { %v585_v47 = vpop.f32.mrf.mxu0  ;;  %v606_v48 = vpop.f32.mrf.mxu1 }
  0xe5   :  { %v586_v53 = vadd.f32 %v585_v47, %v584_v46 }
  0xe6   :  { %v587_v49 = vpop.f32.mrf.mxu0  ;;  %v607_v50 = vpop.f32.mrf.mxu1 }
  0xe7   :  { %v409_v57 = vadd.f32 %v586_v53, %v513_v54  ;;  %v608_v58 = vadd.f32 %v607_v50, %v606_v48 }
  0xe8   :  { %v588_v51 = vpop.f32.mrf.mxu0  ;;  %v609_v52 = vpop.f32.mrf.mxu1 }
  0xe9   :  { %v589_v55 = vadd.f32 %v588_v51, %v587_v49  ;;  %v450_v62 = vadd.f32 %v608_v58, %v409_v57 }
  0xea   :  { %v610_v56 = vpop.f32.mrf.mxu1 }
  0xeb   :  { %v412_v59 = vadd.f32 %v589_v55, %v513_v54  ;;  %v611_v60 = vadd.f32 %v610_v56, %v609_v52 }
  0xed   :  { %v453_v1 = vadd.f32 %v611_v60, %v412_v59 }
 0x102   :  { %v490_v61 = vpop.f32.mrf.mxu0 }
 0x103   :  { %v491_v0 = vadd.f32 %v490_v61, %v450_v62 }
 0x104   :  { %v639_v63 = vpop.f32.mrf.mxu0 }
 0x105   :  { %v497_v5 = vmax.f32 %v491_v0, 0.0 }
 0x106   :  { %v493_v2 = vpop.f32.mrf.mxu0 }
 0x107   :  { %v494_v3 = vadd.f32 %v493_v2, %v453_v1 }
 0x108   :  { %v640_v4 = vpop.f32.mrf.mxu0 }
 0x109   :  { %v498_v6 = vmax.f32 %v494_v3, 0.0 }
 0x10b   :  { %v566_v7 = vpack.c.bf16 %v498_v6, %v497_v5 }
 0x10d   :  { %567 = vst [vmem:[%s856_s3] sm:$0xff] %v566_v7  }

// kernel: rainbow_forward.9
= control target key start
LH: loop header
LB: loop body
LE: loop exit
PB: predicated region body
PF: predicated region fallthrough
CT: control target
= control target key end

     0   :  { %v1733_v1 = vmov 0   ;;  %s2223_s1 = inlined_call_operand.vmem [shape: bf16[128,512], index: 1, kind: input, shape index: {}]   ;;  %s2224_s0 = inlined_call_operand.vmem [shape: bf16[16,128], index: 0, kind: input, shape index: {}]   ;;  %s2225_s2 = inlined_call_operand.vmem [shape: bf16[128,512], index: 2, kind: input, shape index: {}]   ;;  %s2226_s6 = inlined_call_operand.vmem [shape: bf16[512,128], index: 6, kind: input, shape index: {}]   ;;  %s2227_s5 = inlined_call_operand.vmem [shape: bf16[512,128], index: 5, kind: input, shape index: {}]   ;;  %s2228_s4 = inlined_call_operand.vmem [shape: f32[1,512], index: 4, kind: input, shape index: {}]   ;;  %s2229_s3 = inlined_call_operand.vmem [shape: f32[1,512], index: 3, kind: input, shape index: {}]   ;;  %s2230_s7 = inlined_call_operand.vmem [shape: f32[1,128], index: 7, kind: input, shape index: {}]   ;;  %s2231_s8 = inlined_call_operand.vmem [shape: f32[16,128], index: 8, kind: output, shape index: {}]  }
   0x1   :  { %v1572_v0 = vld [vmem:[%s2223_s1 + $0xe4] ss:$16 sps:$4 sm:$0xff]   ;;  %284 = vmatprep.mubr.bf16.mxu0 %v1733_v1  ;;  %327 = vmatprep.mubr.bf16.mxu1 %v1733_v1  ;;  %v1574_v2 = vld [vmem:[%s2223_s1 + $0xec] ss:$16 sps:$4 sm:$0xff]   ;;  %v1576_v3 = vld [vmem:[%s2223_s1 + $0xe0] ss:$16 sps:$4 sm:$0xff]  }
   0x2   :  { %252 = vmatprep.subr.bf16.mxu0 %v1572_v0  ;;  %v1577_v4 = vld [vmem:[%s2223_s1 + $0xe8] ss:$16 sps:$4 sm:$0xff]   ;;  %295 = vmatprep.subr.bf16.mxu1 %v1574_v2  ;;  %v1578_v5 = vld [vmem:[%s2223_s1 + $0xc4] ss:$16 sps:$4 sm:$0xff]   ;;  %v1580_v6 = vld [vmem:[%s2223_s1 + $0xcc] ss:$16 sps:$4 sm:$0xff]  }
   0x3   :  { %253 = vmatpush1.bf16.msra.mxu0 %v1576_v3  ;;  %296 = vmatpush1.bf16.msra.mxu1 %v1577_v4  ;;  %v1582_v7 = vld [vmem:[%s2223_s1 + $0xc0] ss:$16 sps:$4 sm:$0xff]   ;;  %v1583_v8 = vld [vmem:[%s2223_s1 + $0xc8] ss:$16 sps:$4 sm:$0xff]   ;;  %v1584_v9 = vld [vmem:[%s2223_s1 + $0xa4] ss:$16 sps:$4 sm:$0xff]  }
   0x4   :  { %254 = vmatprep.subr.bf16.mxu0 %v1578_v5  ;;  %297 = vmatprep.subr.bf16.mxu1 %v1580_v6  ;;  %v1586_v10 = vld [vmem:[%s2223_s1 + $0xac] ss:$16 sps:$4 sm:$0xff]   ;;  %v1588_v11 = vld [vmem:[%s2223_s1 + $0xa0] ss:$16 sps:$4 sm:$0xff]   ;;  %v1589_v12 = vld [vmem:[%s2223_s1 + $0xa8] ss:$16 sps:$4 sm:$0xff]  }
   0x5   :  { %v1590_v13 = vld [vmem:[%s2223_s1 + $0x84] ss:$16 sps:$4 sm:$0xff]   ;;  %v1592_v14 = vld [vmem:[%s2223_s1 + $0x8c] ss:$16 sps:$4 sm:$0xff]   ;;  %v1594_v15 = vld [vmem:[%s2223_s1 + $0x80] ss:$16 sps:$4 sm:$0xff]  }
   0x6   :  { %v1595_v16 = vld [vmem:[%s2223_s1 + $0x88] ss:$16 sps:$4 sm:$0xff]   ;;  %v1596_v17 = vld [vmem:[%s2223_s1 + $0x64] ss:$16 sps:$4 sm:$0xff]   ;;  %v1598_v18 = vld [vmem:[%s2223_s1 + $0x6c] ss:$16 sps:$4 sm:$0xff]  }
   0x7   :  { %255 = vmatpush1.bf16.msra.mxu0 %v1582_v7  ;;  %298 = vmatpush1.bf16.msra.mxu1 %v1583_v8  ;;  %v1600_v19 = vld [vmem:[%s2223_s1 + $0x60] ss:$16 sps:$4 sm:$0xff]   ;;  %v1601_v20 = vld [vmem:[%s2223_s1 + $0x68] ss:$16 sps:$4 sm:$0xff]   ;;  %v1602_v21 = vld [vmem:[%s2223_s1 + $0x44] ss:$16 sps:$4 sm:$0xff]  }
   0x8   :  { %256 = vmatprep.subr.bf16.mxu0 %v1584_v9  ;;  %299 = vmatprep.subr.bf16.mxu1 %v1586_v10  ;;  %v1604_v22 = vld [vmem:[%s2223_s1 + $0x4c] ss:$16 sps:$4 sm:$0xff]   ;;  %v1606_v23 = vld [vmem:[%s2223_s1 + $0x40] ss:$16 sps:$4 sm:$0xff]   ;;  %v1607_v24 = vld [vmem:[%s2223_s1 + $0x48] ss:$16 sps:$4 sm:$0xff]  }
   0x9   :  { %v1608_v25 = vld [vmem:[%s2223_s1 + $0x24] ss:$16 sps:$4 sm:$0xff]   ;;  %v1610_v26 = vld [vmem:[%s2223_s1 + $0x2c] ss:$16 sps:$4 sm:$0xff]   ;;  %v1612_v27 = vld [vmem:[%s2223_s1 + $0x20] ss:$16 sps:$4 sm:$0xff]  }
   0xa   :  { %v1613_v28 = vld [vmem:[%s2223_s1 + $0x28] ss:$16 sps:$4 sm:$0xff]   ;;  %v1614_v29 = vld [vmem:[%s2223_s1 + $0x4] ss:$16 sps:$4 sm:$0xff]   ;;  %v1616_v30 = vld [vmem:[%s2223_s1 + $0xc] ss:$16 sps:$4 sm:$0xff]  }
   0xb   :  { %257 = vmatpush1.bf16.msra.mxu0 %v1588_v11  ;;  %300 = vmatpush1.bf16.msra.mxu1 %v1589_v12  ;;  %v1618_v31 = vld [vmem:[%s2223_s1] ss:$16 sps:$4 sm:$0xff]   ;;  %v1619_v32 = vld [vmem:[%s2223_s1 + $0x8] ss:$16 sps:$4 sm:$0xff]   ;;  %v1623_v33 = vld [vmem:[%s2225_s2 + $0xe4] ss:$16 sps:$4 sm:$0xff]  }
   0xc   :  { %258 = vmatprep.subr.bf16.mxu0 %v1590_v13  ;;  %301 = vmatprep.subr.bf16.mxu1 %v1592_v14  ;;  %v1626_v34 = vld [vmem:[%s2225_s2 + $0xec] ss:$16 sps:$4 sm:$0xff]   ;;  %v1886_v35 = vld [vmem:[%s2224_s0] sm:$0xff]   ;;  %v1624_v37 = vld [vmem:[%s2225_s2 + $0xe8] ss:$16 sps:$4 sm:$0xff]  }
   0xd   :  { %v1621_v36 = vld [vmem:[%s2225_s2 + $0xe0] ss:$16 sps:$4 sm:$0xff]   ;;  %v1629_v38 = vld [vmem:[%s2225_s2 + $0xc4] ss:$16 sps:$4 sm:$0xff]   ;;  %v1632_v39 = vld [vmem:[%s2225_s2 + $0xcc] ss:$16 sps:$4 sm:$0xff]  }
   0xe   :  { %v1627_v40 = vld [vmem:[%s2225_s2 + $0xc0] ss:$16 sps:$4 sm:$0xff]   ;;  %v1630_v41 = vld [vmem:[%s2225_s2 + $0xc8] ss:$16 sps:$4 sm:$0xff]   ;;  %v1635_v42 = vld [vmem:[%s2225_s2 + $0xa4] ss:$16 sps:$4 sm:$0xff]  }
   0xf   :  { %259 = vmatpush1.bf16.msra.mxu0 %v1594_v15  ;;  %302 = vmatpush1.bf16.msra.mxu1 %v1595_v16  ;;  %v1638_v43 = vld [vmem:[%s2225_s2 + $0xac] ss:$16 sps:$4 sm:$0xff]   ;;  %v1633_v44 = vld [vmem:[%s2225_s2 + $0xa0] ss:$16 sps:$4 sm:$0xff]   ;;  %v1636_v45 = vld [vmem:[%s2225_s2 + $0xa8] ss:$16 sps:$4 sm:$0xff]  }
  0x10   :  { %260 = vmatprep.subr.bf16.mxu0 %v1596_v17  ;;  %303 = vmatprep.subr.bf16.mxu1 %v1598_v18  ;;  %v1641_v46 = vld [vmem:[%s2225_s2 + $0x84] ss:$16 sps:$4 sm:$0xff]   ;;  %v1644_v47 = vld [vmem:[%s2225_s2 + $0x8c] ss:$16 sps:$4 sm:$0xff]   ;;  %v1639_v48 = vld [vmem:[%s2225_s2 + $0x80] ss:$16 sps:$4 sm:$0xff]  }
  0x11   :  { %v1642_v49 = vld [vmem:[%s2225_s2 + $0x88] ss:$16 sps:$4 sm:$0xff]   ;;  %v1647_v50 = vld [vmem:[%s2225_s2 + $0x64] ss:$16 sps:$4 sm:$0xff]   ;;  %v1650_v51 = vld [vmem:[%s2225_s2 + $0x6c] ss:$16 sps:$4 sm:$0xff]  }
  0x12   :  { %v1645_v52 = vld [vmem:[%s2225_s2 + $0x60] ss:$16 sps:$4 sm:$0xff]   ;;  %v1648_v53 = vld [vmem:[%s2225_s2 + $0x68] ss:$16 sps:$4 sm:$0xff]   ;;  %v1653_v54 = vld [vmem:[%s2225_s2 + $0x44] ss:$16 sps:$4 sm:$0xff]  }
  0x13   :  { %261 = vmatpush1.bf16.msra.mxu0 %v1600_v19  ;;  %304 = vmatpush1.bf16.msra.mxu1 %v1601_v20  ;;  %v1656_v55 = vld [vmem:[%s2225_s2 + $0x4c] ss:$16 sps:$4 sm:$0xff]   ;;  %v1651_v56 = vld [vmem:[%s2225_s2 + $0x40] ss:$16 sps:$4 sm:$0xff]   ;;  %v1654_v57 = vld [vmem:[%s2225_s2 + $0x48] ss:$16 sps:$4 sm:$0xff]  }
  0x14   :  { %262 = vmatprep.subr.bf16.mxu0 %v1602_v21  ;;  %305 = vmatprep.subr.bf16.mxu1 %v1604_v22  ;;  %v1659_v58 = vld [vmem:[%s2225_s2 + $0x24] ss:$16 sps:$4 sm:$0xff]   ;;  %v1662_v59 = vld [vmem:[%s2225_s2 + $0x2c] ss:$16 sps:$4 sm:$0xff]   ;;  %v1657_v60 = vld [vmem:[%s2225_s2 + $0x20] ss:$16 sps:$4 sm:$0xff]  }
  0x15   :  { %v1660_v61 = vld [vmem:[%s2225_s2 + $0x28] ss:$16 sps:$4 sm:$0xff]   ;;  %v1665_v62 = vld [vmem:[%s2225_s2 + $0x4] ss:$16 sps:$4 sm:$0xff]   ;;  %v1668_v63 = vld [vmem:[%s2225_s2 + $0xc] ss:$16 sps:$4 sm:$0xff]  }
  0x16   :  { %v1663_v0 = vld [vmem:[%s2225_s2] ss:$16 sps:$4 sm:$0xff]   ;;  %v1669_v2 = vld [vmem:[%s2226_s6 + $0x78] sm:$0xff]   ;;  %v1677_v10 = vld [vmem:[%s2226_s6 + $0x68] sm:$0xff]  }
  0x17   :  { %263 = vmatpush1.bf16.msra.mxu0 %v1606_v23  ;;  %306 = vmatpush1.bf16.msra.mxu1 %v1607_v24  ;;  %v1670_v3 = vld [vmem:[%s2226_s6 + $0xf8] sm:$0xff]   ;;  %v1673_v6 = vld [vmem:[%s2226_s6 + $0x70] sm:$0xff]   ;;  %v1678_v11 = vld [vmem:[%s2226_s6 + $0xe8] sm:$0xff]  }
  0x18   :  { %264 = vmatprep.subr.bf16.mxu0 %v1608_v25  ;;  %307 = vmatprep.subr.bf16.mxu1 %v1610_v26  ;;  %v1671_v4 = vld [vmem:[%s2226_s6 + $0x38] sm:$0xff]   ;;  %v1674_v7 = vld [vmem:[%s2226_s6 + $0xf0] sm:$0xff]   ;;  %v1679_v12 = vld [vmem:[%s2226_s6 + $0x28] sm:$0xff]  }
  0x19   :  { %v1672_v5 = vld [vmem:[%s2226_s6 + $0xb8] sm:$0xff]   ;;  %v1675_v8 = vld [vmem:[%s2226_s6 + $0x30] sm:$0xff]   ;;  %v1680_v13 = vld [vmem:[%s2226_s6 + $0xa8] sm:$0xff]  }
  0x1a   :  { %v1676_v9 = vld [vmem:[%s2226_s6 + $0xb0] sm:$0xff]   ;;  %v1681_v14 = vld [vmem:[%s2226_s6 + $0x60] sm:$0xff]   ;;  %v1685_v18 = vld [vmem:[%s2226_s6 + $0x58] sm:$0xff]  }
  0x1b   :  { %265 = vmatpush1.bf16.msra.mxu0 %v1612_v27  ;;  %308 = vmatpush1.bf16.msra.mxu1 %v1613_v28  ;;  %v1682_v15 = vld [vmem:[%s2226_s6 + $0xe0] sm:$0xff]   ;;  %v1686_v19 = vld [vmem:[%s2226_s6 + $0xd8] sm:$0xff]   ;;  %v1689_v22 = vld [vmem:[%s2226_s6 + $0x50] sm:$0xff]  }
  0x1c   :  { %266 = vmatprep.subr.bf16.mxu0 %v1614_v29  ;;  %309 = vmatprep.subr.bf16.mxu1 %v1616_v30  ;;  %v1683_v16 = vld [vmem:[%s2226_s6 + $0x20] sm:$0xff]   ;;  %v1687_v20 = vld [vmem:[%s2226_s6 + $0x18] sm:$0xff]   ;;  %v1690_v23 = vld [vmem:[%s2226_s6 + $0xd0] sm:$0xff]  }
  0x1d   :  { %v1684_v17 = vld [vmem:[%s2226_s6 + $0xa0] sm:$0xff]   ;;  %v1688_v21 = vld [vmem:[%s2226_s6 + $0x98] sm:$0xff]   ;;  %v1691_v24 = vld [vmem:[%s2226_s6 + $0x10] sm:$0xff]  }
  0x1e   :  { %v1692_v25 = vld [vmem:[%s2226_s6 + $0x90] sm:$0xff]   ;;  %v1693_v26 = vld [vmem:[%s2226_s6 + $0x48] sm:$0xff]   ;;  %v1697_v30 = vld [vmem:[%s2226_s6 + $0x40] sm:$0xff]  }
  0x1f   :  { %267 = vmatpush1.bf16.msra.mxu0 %v1618_v31  ;;  %310 = vmatpush1.bf16.msra.mxu1 %v1619_v32  ;;  %v1694_v27 = vld [vmem:[%s2226_s6 + $0xc8] sm:$0xff]   ;;  %v1698_v31 = vld [vmem:[%s2226_s6 + $0xc0] sm:$0xff]  }
  0x20   :  { %552 = vmatprep.subr.bf16.mxu0 %v1623_v33  ;;  %595 = vmatprep.subr.bf16.mxu1 %v1626_v34  ;;  %v1695_v28 = vld [vmem:[%s2226_s6 + $0x8] sm:$0xff]   ;;  %v1699_v32 = vld [vmem:[%s2226_s6] sm:$0xff]   ;;  %v1701_v34 = vld [vmem:[%s2227_s5 + $0x78] sm:$0xff]  }
  0x21   :  { %v1696_v29 = vld [vmem:[%s2226_s6 + $0x88] sm:$0xff]   ;;  %v1700_v33 = vld [vmem:[%s2226_s6 + $0x80] sm:$0xff]  }
  0x22   :  { %285 = vmatmul.mubr.bf16.vlgmr.msra.gmra.mxu0 %v1886_v35  ;;  %328 = vmatmul.mubr.bf16.vlgmr.msra.gmra.mxu1 %v1886_v35 }
  0x23   :  { %553 = vmatpush1.bf16.msra.mxu0 %v1621_v36  ;;  %596 = vmatpush1.bf16.msra.mxu1 %v1624_v37 }
  0x24   :  { %554 = vmatprep.subr.bf16.mxu0 %v1629_v38  ;;  %597 = vmatprep.subr.bf16.mxu1 %v1632_v39 }
  0x25   :  { %584 = vmatprep.mubr.bf16.mxu0 %v1733_v1  ;;  %627 = vmatprep.mubr.bf16.mxu1 %v1733_v1  ;;  %v1666_v1 = vld [vmem:[%s2225_s2 + $0x8] ss:$16 sps:$4 sm:$0xff]  }
  0x27   :  { %555 = vmatpush1.bf16.msra.mxu0 %v1627_v40  ;;  %598 = vmatpush1.bf16.msra.mxu1 %v1630_v41  ;;  %v66_v40 = vlaneseq }
  0x28   :  { %556 = vmatprep.subr.bf16.mxu0 %v1635_v42  ;;  %599 = vmatprep.subr.bf16.mxu1 %v1638_v43 }
  0x29   :  { %v2094_v43 = vshrl.u32 %v66_v40, 7  ;;  %v1709_v40 = vld [vmem:[%s2227_s5 + $0x68] sm:$0xff]  }
  0x2b   :  { %557 = vmatpush1.bf16.msra.mxu0 %v1633_v44  ;;  %600 = vmatpush1.bf16.msra.mxu1 %v1636_v45 }
  0x2c   :  { %558 = vmatprep.subr.bf16.mxu0 %v1641_v46  ;;  %601 = vmatprep.subr.bf16.mxu1 %v1644_v47  ;;  %v72_v46 = vsub.s32 1, %v2094_v43  ;;  %v80_v47 = vsub.s32 3, %v2094_v43 }
  0x2f   :  { %559 = vmatpush1.bf16.msra.mxu0 %v1639_v48  ;;  %602 = vmatpush1.bf16.msra.mxu1 %v1642_v49  ;;  %v370_v48 = vld [vmem:[%s2228_s4] sm:$0xf]  ;;  %v68_v49 = vsub.s32 0, %v2094_v43 }
  0x30   :  { %560 = vmatprep.subr.bf16.mxu0 %v1647_v50  ;;  %603 = vmatprep.subr.bf16.mxu1 %v1650_v51  ;;  %v76_v50 = vsub.s32 2, %v2094_v43  ;;  %v1729_v43 = vld [vmem:[%s2227_s5 + $0x40] sm:$0xff]  }
  0x33   :  { %561 = vmatpush1.bf16.msra.mxu0 %v1645_v52  ;;  %604 = vmatpush1.bf16.msra.mxu1 %v1648_v53  ;;  %v2106_v53 = vld [vmem:[%s2229_s3] sm:$0xf] }
  0x34   :  { %562 = vmatprep.subr.bf16.mxu0 %v1653_v54  ;;  %605 = vmatprep.subr.bf16.mxu1 %v1656_v55  ;;  %v379_v54 = vrot.slane %v370_v48, %v72_v46  ;;  %v387_v55 = vrot.slane %v370_v48, %v80_v47 }
  0x37   :  { %563 = vmatpush1.bf16.msra.mxu0 %v1651_v56  ;;  %606 = vmatpush1.bf16.msra.mxu1 %v1654_v57  ;;  %v375_v56 = vrot.slane %v370_v48, %v68_v49  ;;  %v383_v57 = vrot.slane %v370_v48, %v76_v50  ;;  %v1714_v48 = vld [vmem:[%s2227_s5 + $0xe0] sm:$0xff]  }
  0x38   :  { %564 = vmatprep.subr.bf16.mxu0 %v1659_v58  ;;  %607 = vmatprep.subr.bf16.mxu1 %v1662_v59 }
  0x3b   :  { %565 = vmatpush1.bf16.msra.mxu0 %v1657_v60  ;;  %608 = vmatpush1.bf16.msra.mxu1 %v1660_v61  ;;  %v73_v60 = vrot.slane %v2106_v53, %v72_v46  ;;  %v81_v61 = vrot.slane %v2106_v53, %v80_v47  ;;  %v1712_v46 = vld [vmem:[%s2227_s5 + $0xa8] sm:$0xff]   ;;  %v1713_v47 = vld [vmem:[%s2227_s5 + $0x60] sm:$0xff]  }
  0x3c   :  { %566 = vmatprep.subr.bf16.mxu0 %v1665_v62  ;;  %609 = vmatprep.subr.bf16.mxu1 %v1668_v63 }
  0x3f   :  { %567 = vmatpush1.bf16.msra.mxu0 %v1663_v0  ;;  %610 = vmatpush1.bf16.msra.mxu1 %v1666_v1 }
  0x40   :  { %1483 = vmatprep.subr.bf16.mxu0 %v1669_v2  ;;  %1505 = vmatprep.subr.bf16.mxu1 %v1670_v3 }
  0x42   :  { %585 = vmatmul.mubr.bf16.vlgmr.msra.gmra.mxu0 %v1886_v35  ;;  %628 = vmatmul.mubr.bf16.vlgmr.msra.gmra.mxu1 %v1886_v35  ;;  %v1702_v35 = vld [vmem:[%s2227_s5 + $0xf8] sm:$0xff]  }
  0x43   :  { %1484 = vmatpush3.bf16.msra.mxu0 %v1671_v4  ;;  %1506 = vmatpush3.bf16.msra.mxu1 %v1672_v5 }
  0x44   :  { %1485 = vmatprep.subr.bf16.mxu0 %v1673_v6  ;;  %1507 = vmatprep.subr.bf16.mxu1 %v1674_v7 }
  0x47   :  { %1486 = vmatpush3.bf16.msra.mxu0 %v1675_v8  ;;  %1508 = vmatpush3.bf16.msra.mxu1 %v1676_v9 }
  0x48   :  { %1487 = vmatprep.subr.bf16.mxu0 %v1677_v10  ;;  %1509 = vmatprep.subr.bf16.mxu1 %v1678_v11 }
  0x4b   :  { %1488 = vmatpush3.bf16.msra.mxu0 %v1679_v12  ;;  %1510 = vmatpush3.bf16.msra.mxu1 %v1680_v13 }
  0x4c   :  { %1489 = vmatprep.subr.bf16.mxu0 %v1681_v14  ;;  %1511 = vmatprep.subr.bf16.mxu1 %v1682_v15 }
  0x4f   :  { %1490 = vmatpush3.bf16.msra.mxu0 %v1683_v16  ;;  %1512 = vmatpush3.bf16.msra.mxu1 %v1684_v17 }
  0x50   :  { %1491 = vmatprep.subr.bf16.mxu0 %v1685_v18  ;;  %1513 = vmatprep.subr.bf16.mxu1 %v1686_v19 }
  0x53   :  { %1492 = vmatpush3.bf16.msra.mxu0 %v1687_v20  ;;  %1514 = vmatpush3.bf16.msra.mxu1 %v1688_v21 }
  0x54   :  { %1493 = vmatprep.subr.bf16.mxu0 %v1689_v22  ;;  %1515 = vmatprep.subr.bf16.mxu1 %v1690_v23 }
  0x57   :  { %1494 = vmatpush3.bf16.msra.mxu0 %v1691_v24  ;;  %1516 = vmatpush3.bf16.msra.mxu1 %v1692_v25 }
  0x58   :  { %1495 = vmatprep.subr.bf16.mxu0 %v1693_v26  ;;  %1517 = vmatprep.subr.bf16.mxu1 %v1694_v27  ;;  %v1703_v26 = vld [vmem:[%s2227_s5 + $0x38] sm:$0xff]  }
  0x59   :  { %v1704_v27 = vld [vmem:[%s2227_s5 + $0xb8] sm:$0xff]  }
  0x5b   :  { %1496 = vmatpush3.bf16.msra.mxu0 %v1695_v28  ;;  %1518 = vmatpush3.bf16.msra.mxu1 %v1696_v29 }
  0x5c   :  { %1497 = vmatprep.subr.bf16.mxu0 %v1697_v30  ;;  %1519 = vmatprep.subr.bf16.mxu1 %v1698_v31 }
  0x5f   :  { %1498 = vmatpush3.bf16.msra.mxu0 %v1699_v32  ;;  %1520 = vmatpush3.bf16.msra.mxu1 %v1700_v33  ;;  %v1705_v32 = vld [vmem:[%s2227_s5 + $0x70] sm:$0xff]  }
  0x60   :  { %1527 = vmatprep.subr.bf16.mxu0 %v1701_v34  ;;  %1549 = vmatprep.subr.bf16.mxu1 %v1702_v35  ;;  %v1706_v33 = vld [vmem:[%s2227_s5 + $0xf0] sm:$0xff]  }
  0xe2   :  { %v2086_v36 = vpop.f32.mrf.mxu0  ;;  %v2088_v37 = vpop.f32.mrf.mxu1 }
  0xe4   :  { %v288_v38 = vpop.f32.mrf.mxu0  ;;  %v331_v39 = vpop.f32.mrf.mxu1 }
  0xe5   :  { %v289_v12 = vadd.f32 %v288_v38, %v73_v60  ;;  %v332_v13 = vadd.f32 %v331_v39, %v81_v61  ;;  %v1707_v38 = vld [vmem:[%s2227_s5 + $0x30] sm:$0xff]  }
  0xe6   :  { %v2090_v41 = vpop.f32.mrf.mxu0  ;;  %v2092_v42 = vpop.f32.mrf.mxu1  ;;  %v1708_v39 = vld [vmem:[%s2227_s5 + $0xb0] sm:$0xff]  }
  0xe7   :  { %v639_v28 = vmax.f32 %v289_v12, 0.0  ;;  %v641_v29 = vmax.f32 %v332_v13, 0.0 }
  0xe8   :  { %v292_v44 = vpop.f32.mrf.mxu0  ;;  %v335_v45 = vpop.f32.mrf.mxu1 }
  0xe9   :  { %v293_v4 = vadd.f32 %v292_v44, %v73_v60  ;;  %v336_v5 = vadd.f32 %v335_v45, %v81_v61  ;;  %v1710_v44 = vld [vmem:[%s2227_s5 + $0xe8] sm:$0xff]   ;;  %v1723_v60 = vld [vmem:[%s2227_s5 + $0x10] sm:$0xff]  }
  0xea   :  { %v1711_v45 = vld [vmem:[%s2227_s5 + $0x28] sm:$0xff]   ;;  %v1724_v61 = vld [vmem:[%s2227_s5 + $0x90] sm:$0xff]  }
  0xeb   :  { %v643_v20 = vmax.f32 %v293_v4, 0.0  ;;  %v645_v21 = vmax.f32 %v336_v5, 0.0 }
  0xed   :  { %v647_v34 = vpack.c.bf16 %v643_v20, %v639_v28  ;;  %v649_v35 = vpack.c.bf16 %v645_v21, %v641_v29 }
 0x102   :  { %v586_v51 = vpop.f32.mrf.mxu0  ;;  %v629_v52 = vpop.f32.mrf.mxu1 }
 0x103   :  { %v587_v6 = vadd.f32 %v586_v51, %v375_v56  ;;  %v630_v7 = vadd.f32 %v629_v52, %v383_v57  ;;  %v1715_v51 = vld [vmem:[%s2227_s5 + $0x20] sm:$0xff]  }
 0x104   :  { %v588_v58 = vpop.f32.mrf.mxu0  ;;  %v631_v59 = vpop.f32.mrf.mxu1  ;;  %v1716_v52 = vld [vmem:[%s2227_s5 + $0xa0] sm:$0xff]  }
 0x105   :  { %v589_v0 = vadd.f32 %v588_v58, %v379_v54  ;;  %v632_v1 = vadd.f32 %v631_v59, %v387_v55  ;;  %v650_v22 = vmax.f32 %v587_v6, 0.0  ;;  %v652_v23 = vmax.f32 %v630_v7, 0.0  ;;  %v1721_v58 = vld [vmem:[%s2227_s5 + $0x50] sm:$0xff]  }
 0x106   :  { %v590_v62 = vpop.f32.mrf.mxu0  ;;  %v633_v63 = vpop.f32.mrf.mxu1  ;;  %v1722_v59 = vld [vmem:[%s2227_s5 + $0xd0] sm:$0xff]  }
 0x107   :  { %v591_v2 = vadd.f32 %v590_v62, %v375_v56  ;;  %v634_v3 = vadd.f32 %v633_v63, %v383_v57  ;;  %v651_v16 = vmax.f32 %v589_v0, 0.0  ;;  %v653_v17 = vmax.f32 %v632_v1, 0.0  ;;  %v1719_v56 = vld [vmem:[%s2227_s5 + $0x18] sm:$0xff]   ;;  %v1725_v63 = vld [vmem:[%s2227_s5 + $0x48] sm:$0xff]  }
 0x108   :  { %v592_v8 = vpop.f32.mrf.mxu0  ;;  %v635_v9 = vpop.f32.mrf.mxu1  ;;  %v1720_v57 = vld [vmem:[%s2227_s5 + $0x98] sm:$0xff]   ;;  %v77_v62 = vrot.slane %v2106_v53, %v76_v50  ;;  %v1726_v0 = vld [vmem:[%s2227_s5 + $0xc8] sm:$0xff]   ;;  %v69_v1 = vrot.slane %v2106_v53, %v68_v49  ;;  %v1730_v49 = vld [vmem:[%s2227_s5 + $0xc0] sm:$0xff]  }
 0x109   :  { %v593_v10 = vadd.f32 %v592_v8, %v379_v54  ;;  %v636_v11 = vadd.f32 %v635_v9, %v387_v55  ;;  %v654_v14 = vmax.f32 %v591_v2, 0.0  ;;  %v656_v15 = vmax.f32 %v634_v3, 0.0  ;;  %v1717_v54 = vld [vmem:[%s2227_s5 + $0x58] sm:$0xff]   ;;  %v1727_v50 = vld [vmem:[%s2227_s5 + $0x8] sm:$0xff]  }
 0x10a   :  { %v1718_v55 = vld [vmem:[%s2227_s5 + $0xd8] sm:$0xff]   ;;  %v1728_v2 = vld [vmem:[%s2227_s5 + $0x88] sm:$0xff]   ;;  %v330_v3 = vadd.f32 %v2088_v37, %v77_v62  ;;  %v291_v4 = vadd.f32 %v2090_v41, %v69_v1  ;;  %v334_v5 = vadd.f32 %v2092_v42, %v77_v62  ;;  %v287_v53 = vadd.f32 %v2086_v36, %v69_v1  ;;  %v1731_v37 = vld [vmem:[%s2227_s5] sm:$0xff]  }
 0x10b   :  { %v655_v18 = vmax.f32 %v593_v10, 0.0  ;;  %v657_v19 = vmax.f32 %v636_v11, 0.0  ;;  %v658_v30 = vpack.c.bf16 %v654_v14, %v650_v22  ;;  %v660_v31 = vpack.c.bf16 %v656_v15, %v652_v23  ;;  %v1732_v41 = vld [vmem:[%s2227_s5 + $0x80] sm:$0xff]  }
 0x10c   :  { %v640_v42 = vmax.f32 %v330_v3, 0.0  ;;  %v642_v6 = vmax.f32 %v291_v4, 0.0  ;;  %v644_v7 = vmax.f32 %v334_v5, 0.0  ;;  %v638_v8 = vmax.f32 %v287_v53, 0.0 }
 0x10d   :  { %v659_v24 = vpack.c.bf16 %v655_v18, %v651_v16  ;;  %v661_v25 = vpack.c.bf16 %v657_v19, %v653_v17 }
 0x10e   :  { %v646_v9 = vpack.c.bf16 %v642_v6, %v638_v8  ;;  %v648_v36 = vpack.c.bf16 %v644_v7, %v640_v42 }
 0x10f   :  { %1014 = vmatprep.mubr.bf16.mxu0 %v659_v24  ;;  %1055 = vmatprep.mubr.bf16.mxu1 %v661_v25 }
 0x110   :  { %1015 = vmatmul.mubr.bf16.vlgmr.msra.gmra.mxu0 %v658_v30  ;;  %1056 = vmatmul.mubr.bf16.vlgmr.msra.gmra.mxu1 %v660_v31 }
 0x111   :  { %1528 = vmatpush3.bf16.msra.mxu0 %v1703_v26  ;;  %1550 = vmatpush3.bf16.msra.mxu1 %v1704_v27 }
 0x112   :  { %1288 = vmatprep.mubr.bf16.mxu0 %v647_v34  ;;  %1329 = vmatprep.mubr.bf16.mxu1 %v649_v35 }
 0x113   :  { %1529 = vmatprep.subr.bf16.mxu0 %v1705_v32  ;;  %1551 = vmatprep.subr.bf16.mxu1 %v1706_v33  ;;  %v1482_v32 = vld [vmem:[%s2230_s7] ss:$0 sm:$0xff] }
 0x115   :  { %1530 = vmatpush3.bf16.msra.mxu0 %v1707_v38  ;;  %1552 = vmatpush3.bf16.msra.mxu1 %v1708_v39 }
 0x116   :  { %1531 = vmatprep.subr.bf16.mxu0 %v1709_v40  ;;  %1553 = vmatprep.subr.bf16.mxu1 %v1710_v44 }
 0x119   :  { %1532 = vmatpush3.bf16.msra.mxu0 %v1711_v45  ;;  %1554 = vmatpush3.bf16.msra.mxu1 %v1712_v46 }
 0x11a   :  { %1533 = vmatprep.subr.bf16.mxu0 %v1713_v47  ;;  %1555 = vmatprep.subr.bf16.mxu1 %v1714_v48 }
 0x11d   :  { %1534 = vmatpush3.bf16.msra.mxu0 %v1715_v51  ;;  %1556 = vmatpush3.bf16.msra.mxu1 %v1716_v52 }
 0x11e   :  { %1535 = vmatprep.subr.bf16.mxu0 %v1717_v54  ;;  %1557 = vmatprep.subr.bf16.mxu1 %v1718_v55 }
 0x121   :  { %1536 = vmatpush3.bf16.msra.mxu0 %v1719_v56  ;;  %1558 = vmatpush3.bf16.msra.mxu1 %v1720_v57 }
 0x122   :  { %1537 = vmatprep.subr.bf16.mxu0 %v1721_v58  ;;  %1559 = vmatprep.subr.bf16.mxu1 %v1722_v59 }
 0x125   :  { %1538 = vmatpush3.bf16.msra.mxu0 %v1723_v60  ;;  %1560 = vmatpush3.bf16.msra.mxu1 %v1724_v61 }
 0x126   :  { %1539 = vmatprep.subr.bf16.mxu0 %v1725_v63  ;;  %1561 = vmatprep.subr.bf16.mxu1 %v1726_v0 }
 0x129   :  { %1540 = vmatpush3.bf16.msra.mxu0 %v1727_v50  ;;  %1562 = vmatpush3.bf16.msra.mxu1 %v1728_v2 }
 0x12a   :  { %1541 = vmatprep.subr.bf16.mxu0 %v1729_v43  ;;  %1563 = vmatprep.subr.bf16.mxu1 %v1730_v49 }
 0x12d   :  { %1542 = vmatpush3.bf16.msra.mxu0 %v1731_v37  ;;  %1564 = vmatpush3.bf16.msra.mxu1 %v1732_v41 }
 0x130   :  { %1289 = vmatmul.mubr.bf16.vlgmr.msra.gmra.mxu0 %v646_v9  ;;  %1330 = vmatmul.mubr.bf16.vlgmr.msra.gmra.mxu1 %v648_v36 }
 0x1d0   :  { %v1499_v10 = vpop.f32.mrf.mxu0  ;;  %v1521_v11 = vpop.f32.mrf.mxu1 }
 0x1d2   :  { %v1500_v12 = vpop.f32.mrf.mxu0  ;;  %v1522_v13 = vpop.f32.mrf.mxu1 }
 0x1d3   :  { %v1501_v18 = vadd.f32 %v1500_v12, %v1499_v10  ;;  %v1523_v19 = vadd.f32 %v1522_v13, %v1521_v11 }
 0x1d4   :  { %v1502_v14 = vpop.f32.mrf.mxu0  ;;  %v1524_v15 = vpop.f32.mrf.mxu1 }
 0x1d5   :  { %v1058_v24 = vadd.f32 %v1523_v19, %v1501_v18 }
 0x1d6   :  { %v1503_v16 = vpop.f32.mrf.mxu0  ;;  %v1525_v17 = vpop.f32.mrf.mxu1 }
 0x1d7   :  { %v1504_v25 = vadd.f32 %v1503_v16, %v1502_v14  ;;  %v1526_v26 = vadd.f32 %v1525_v17, %v1524_v15 }
 0x1d9   :  { %v1061_v35 = vadd.f32 %v1526_v26, %v1504_v25 }
 0x1f0   :  { %v1543_v20 = vpop.f32.mrf.mxu0  ;;  %v1565_v21 = vpop.f32.mrf.mxu1 }
 0x1f2   :  { %v1544_v22 = vpop.f32.mrf.mxu0  ;;  %v1566_v23 = vpop.f32.mrf.mxu1 }
 0x1f3   :  { %v1545_v27 = vadd.f32 %v1544_v22, %v1543_v20  ;;  %v1567_v31 = vadd.f32 %v1566_v23, %v1565_v21 }
 0x1f4   :  { %v1546_v28 = vpop.f32.mrf.mxu0  ;;  %v1568_v29 = vpop.f32.mrf.mxu1 }
 0x1f5   :  { %v1291_v30 = vadd.f32 %v1545_v27, %v1058_v24 }
 0x1f6   :  { %v1547_v33 = vpop.f32.mrf.mxu0  ;;  %v1569_v34 = vpop.f32.mrf.mxu1 }
 0x1f7   :  { %v1332_v38 = vadd.f32 %v1567_v31, %v1291_v30  ;;  %v1548_v39 = vadd.f32 %v1547_v33, %v1546_v28  ;;  %v1570_v45 = vadd.f32 %v1569_v34, %v1568_v29 }
 0x1f9   :  { %v1345_v40 = vadd.f32 %v1482_v32, %v1332_v38  ;;  %v1294_v44 = vadd.f32 %v1548_v39, %v1061_v35 }
 0x1fb   :  { %1347 = vst [vmem:[%s2231_s8] sm:$0xff] %v1345_v40  ;;  %v1335_v46 = vadd.f32 %v1570_v45, %v1294_v44 }
 0x1fd   :  { %v1346_v47 = vadd.f32 %v1482_v32, %v1335_v46 }
 0x1ff   :  { %1348 = vst [vmem:[%s2231_s8 + $0x8] sm:$0xff] %v1346_v47 }

</bundles_post_ra>
